<compile_context>
chip_gen: v7x
topology: tpu7x:2x2x1
jax: 0.10.0
libtpu: 0.0.40
codegen_flags: <defaults>
</compile_context>

<pallas_src>
import jax
import jax.numpy as jnp
from jax import lax
from jax.experimental import pallas as pl
from jax.experimental.pallas import tpu as pltpu


# ----------------------------------------------------------------------------
# helpers
# ----------------------------------------------------------------------------
def _full_spec(shape):
    # whole-array block for grid=(1,)
    return pl.BlockSpec(shape, lambda i: (0,) * len(shape))


def _softmax(x, axis):
    # exact division (f32 parity with the PyTorch reference)
    m = jnp.max(x, axis=axis, keepdims=True)
    e = jnp.exp(x - m)
    return e / jnp.sum(e, axis=axis, keepdims=True)


def _gate_update_ifog(gates, c, H):
    """gates: (N, 4H) pre-activations in [i, f, o, g] order.
    One contiguous sigmoid over 3H lanes + one tanh over H lanes."""
    sg = jax.nn.sigmoid(gates[:, :3 * H])
    g = jnp.tanh(gates[:, 3 * H:])
    c_new = sg[:, H:2 * H] * c + sg[:, :H] * g
    h_new = sg[:, 2 * H:3 * H] * jnp.tanh(c_new)
    return h_new, c_new


def _reorder_gates(w, H):
    """torch gate order [i, f, g, o] -> [i, f, o, g] (columns)."""
    return jnp.concatenate([w[:, 0:H], w[:, H:2 * H], w[:, 3 * H:4 * H],
                            w[:, 2 * H:3 * H]], axis=1)


def _fuse_bilstm_weights(wxf, whf, bf, wxb, whb, bb):
    """Fuse fwd/bwd LSTM weights (weight-prep time, runs once outside kernels).

    Returns:
      wx_cat: (D, 8H)   columns = [fwd i f o g | bwd i f o g]
      wh_blk: (2H, 8H)  block-diagonal: rows 0:H feed fwd cols, rows H:2H feed bwd cols
      b_cat:  (1, 8H)
    """
    H = whf.shape[0]
    wxf_r, wxb_r = _reorder_gates(wxf, H), _reorder_gates(wxb, H)
    whf_r, whb_r = _reorder_gates(whf, H), _reorder_gates(whb, H)
    bf_r, bb_r = _reorder_gates(bf, H), _reorder_gates(bb, H)

    wx_cat = jnp.concatenate([wxf_r, wxb_r], axis=1)               # (D, 8H)
    b_cat = jnp.concatenate([bf_r, bb_r], axis=1)                  # (1, 8H)
    z = jnp.zeros((H, 4 * H), jnp.float32)
    wh_blk = jnp.concatenate([jnp.concatenate([whf_r, z], axis=1),
                              jnp.concatenate([z, whb_r], axis=1)], axis=0)  # (2H, 8H)
    return wx_cat, wh_blk, b_cat


def _fuse_decoder_lstm(wx, wh, b):
    """Fuse decoder input/recurrence weights: gates = [dec_in | h] @ wxh + b."""
    H = wh.shape[0]
    wxh = jnp.concatenate([_reorder_gates(wx, H), _reorder_gates(wh, H)], axis=0)
    return wxh, _reorder_gates(b, H)


# ----------------------------------------------------------------------------
# Kernel 1: bidirectional LSTM, returns cat(h_fwd, h_bwd) per sequence
# ----------------------------------------------------------------------------
def _bilstm_kernel(x_ref, wx_ref, wh_ref, b_ref, out_ref):
    n, T, D = x_ref.shape
    H4 = wx_ref.shape[1] // 2        # 4H
    H = H4 // 4
    H2 = wh_ref.shape[0]             # 2H

    # ONE fused input projection for both directions (hoisted out of the time loop).
    x2 = x_ref[...].reshape(n * T, D)
    gx = (jnp.dot(x2, wx_ref[...], preferred_element_type=jnp.float32)
          + b_ref[...]).reshape(n, T, 2 * H4)          # (n, T, 8H)

    wh = wh_ref[...]                                    # (2H, 8H), block-diagonal

    h = jnp.zeros((n, H2), jnp.float32)                 # [h_fwd | h_bwd]
    cf = jnp.zeros((n, H), jnp.float32)
    cb = jnp.zeros((n, H), jnp.float32)

    def step(h, cf, cb, gxf_t, gxb_t):
        # ONE fused recurrence matmul: [hf|hb] @ blockdiag(whf, whb)
        rec = jnp.dot(h, wh, preferred_element_type=jnp.float32)   # (n, 8H)
        hf, cf = _gate_update_ifog(gxf_t + rec[:, :H4], cf, H)
        hb, cb = _gate_update_ifog(gxb_t + rec[:, H4:], cb, H)
        return jnp.concatenate([hf, hb], axis=-1), cf, cb

    if T <= 64:
        # static unroll (full LLO scheduler visibility); static slices only
        for t in range(T):
            h, cf, cb = step(h, cf, cb, gx[:, t, :H4], gx[:, T - 1 - t, H4:])
    else:
        # TODO(synk): for long sequences, store gx time-major in a VMEM scratch and
        # read per step with leading-axis pl.ds to avoid sublane-axis dynamic slices.
        def body(t, carry):
            h, cf, cb = carry
            gf = lax.dynamic_slice_in_dim(gx, t, 1, axis=1)[:, 0, :H4]
            gb = lax.dynamic_slice_in_dim(gx, T - 1 - t, 1, axis=1)[:, 0, H4:]
            return step(h, cf, cb, gf, gb)
        h, cf, cb = lax.fori_loop(0, T, body, (h, cf, cb))

    out_ref[...] = h        # already cat(h_fwd, h_bwd)  -> (n, 2H)


def bilstm_final(x_btd, lstm_params):
    """x_btd: (N, T, D) batch-major -> cat(h_fwd, h_bwd): (N, 2H)."""
    wx_cat, wh_blk, b_cat = lstm_params
    N, T, D = x_btd.shape
    H2 = wh_blk.shape[0]

    # Largest tile over independent sequences that keeps the input block + hoisted
    # gate slab inside a conservative VMEM budget (fits default scoped VMEM on all gens).
    tile_n = N
    if N % 8 == 0:
        budget = 6 * 1024 * 1024
        per_row = 4 * (2 * T * D + T * 4 * H2 + 2 * H2)   # input(x2 dbuf)+gates+out(dbuf)
        tile_n = 8
        for cand in (256, 128, 64, 32, 16, 8):
            if N % cand == 0 and cand * per_row <= budget:
                tile_n = cand
                break
    grid = (N // tile_n,)
    # TODO(synk): for very large tiles, raise vmem_limit_bytes via CompilerParams
    # (re-budget per chip generation: v7x has 64 MiB physical VMEM).

    in_specs = [pl.BlockSpec((tile_n, T, D), lambda i: (i, 0, 0)),
                pl.BlockSpec(wx_cat.shape, lambda i: (0, 0)),
                pl.BlockSpec(wh_blk.shape, lambda i: (0, 0)),
                pl.BlockSpec(b_cat.shape, lambda i: (0, 0))]

    return pl.pallas_call(
        _bilstm_kernel,
        out_shape=jax.ShapeDtypeStruct((N, H2), jnp.float32),
        grid=grid,
        in_specs=in_specs,
        out_specs=pl.BlockSpec((tile_n, H2), lambda i: (i, 0)),
        compiler_params=pltpu.CompilerParams(
            dimension_semantics=("parallel",)),
    )(x_btd, wx_cat, wh_blk, b_cat)


# ----------------------------------------------------------------------------
# Kernel 2: fused claim-guided attention + projections + hierarchical decoder
# (word_level_rep / sentence_level_rep stay in VMEM, never written to HBM)
# ----------------------------------------------------------------------------
def _attn_decoder_kernel(af_ref, cr_ref, w1_ref, wpw_ref, wps_ref,
                         w2_ref, wxh_ref, b_ref, w4_ref, wout_ref, bout_ref,
                         gen_ref, grep_ref, hseq_ref):
    B, A, E = af_ref.shape
    H = wpw_ref.shape[1]
    L = gen_ref.shape[0] // B         # max_len  (gen stored as (L*B, V))

    af = af_ref[...]                  # (B, A, 2H) article reps
    cr = cr_ref[...]                  # (B, 2H)    claim rep

    # claim-guided attention: (af @ W1) . cr  ==  af . (cr @ W1^T)
    u = lax.dot_general(cr, w1_ref[...], (((1,), (1,)), ((), ())),
                        preferred_element_type=jnp.float32)        # (B, E)
    scores = jnp.sum(af * u[:, None, :], axis=-1)                  # (B, A)
    attw = _softmax(scores, axis=1)
    agg = jnp.sum(attw[:, :, None] * af, axis=1)                   # (B, E)

    # projections (kept on-chip)
    wl = jnp.dot(af.reshape(B * A, E), wpw_ref[...],
                 preferred_element_type=jnp.float32).reshape(B, A, H)   # word_level_rep
    sl = jnp.dot(agg, wps_ref[...], preferred_element_type=jnp.float32)  # (B, H)

    # decoder setup
    w2 = w2_ref[...].reshape(1, 1, H)
    wxh = wxh_ref[...]                # (2H, 4H) = [W_ih^T ; W_hh^T], gates [i,f,o,g]
    b = b_ref[...]                    # (1, 4H)
    w4 = w4_ref[...]                  # (2H, H)
    # Sentence-level attention over a length-1 memory bank is the identity
    # (softmax of one score == 1)  ->  its contribution is loop-invariant: hoist.
    sent_pre = jnp.dot(sl, w4[:H, :], preferred_element_type=jnp.float32)   # (B, H)
    w4_word = w4[H:, :]

    h = jnp.zeros((B, H), jnp.float32)
    c = jnp.zeros((B, H), jnp.float32)
    for t in range(L):                # static unroll (max_len small & static)
        sc = jnp.sum(jnp.tanh(wl + h[:, None, :]) * w2, axis=-1)   # (B, A)
        aw = _softmax(sc, axis=1)
        word_ctx = jnp.sum(aw[:, :, None] * wl, axis=1)            # (B, H)
        dec_in = jnp.tanh(
            sent_pre + jnp.dot(word_ctx, w4_word,
                               preferred_element_type=jnp.float32))
        # ONE fused input+recurrence matmul for the decoder LSTM step
        gates = jnp.dot(jnp.concatenate([dec_in, h], axis=-1), wxh,
                        preferred_element_type=jnp.float32) + b
        h, c = _gate_update_ifog(gates, c, H)
        hseq_ref[pl.ds(t * B, B), :] = h        # VMEM scratch bounds h_t live range

    # Deferred vocab projection: ONE dense (L*B, H) x (H, V) matmul + dense store.
    # TODO(synk): for a real vocabulary, tile this matmul over V (grid axis with a
    # (H, tile_V) wout BlockSpec, tile_V a multiple of 128) to bound VMEM on v7x.
    gen_ref[...] = (jnp.dot(hseq_ref[...], wout_ref[...],
                            preferred_element_type=jnp.float32) + bout_ref[...])
    grep_ref[...] = h


def attn_decoder(article_final, claim_rep, enc_dec_params, max_len):
    w1, wpw, wps, w2, wxh, b, w4, wout, bout = enc_dec_params
    B, A, E = article_final.shape
    H = wpw.shape[1]
    V = wout.shape[1]
    args = (article_final, claim_rep, w1, wpw, wps, w2, wxh, b, w4, wout, bout)
    # TODO(synk): for large B / V, replace grid=(1,) with parallel grid axes over
    # batch and vocab so v7x's second TensorCore is used.
    gen_flat, g_rep = pl.pallas_call(
        _attn_decoder_kernel,
        out_shape=(jax.ShapeDtypeStruct((max_len * B, V), jnp.float32),
                   jax.ShapeDtypeStruct((B, H), jnp.float32)),
        grid=(1,),
        in_specs=[_full_spec(a.shape) for a in args],
        out_specs=(_full_spec((max_len * B, V)), _full_spec((B, H))),
        scratch_shapes=[pltpu.VMEM((max_len * B, H), jnp.float32)],
    )(*args)
    # wrapper-side reshape/transpose (tiny, outside the kernel)
    gen = gen_flat.reshape(max_len, B, V).transpose(1, 0, 2)
    return gen, g_rep


# ----------------------------------------------------------------------------
# parameter construction (deterministic, synthetic) + weight prep
# ----------------------------------------------------------------------------
def _uniform(key, shape, scale=0.1):
    return jax.random.uniform(key, shape, jnp.float32, -scale, scale)


def init_params(key, input_dim, hidden_dim, vocab_size):
    H, D, V = hidden_dim, input_dim, vocab_size
    ks = iter(jax.random.split(key, 32))

    def lstm_dir(d_in):
        return (_uniform(next(ks), (d_in, 4 * H)),   # Wx  (= W_ih^T), torch order [i,f,g,o]
                _uniform(next(ks), (H, 4 * H)),      # Wh  (= W_hh^T)
                _uniform(next(ks), (1, 4 * H)))      # b   (= b_ih + b_hh)

    claim_raw = lstm_dir(D) + lstm_dir(D)            # fwd + bwd
    article_raw = lstm_dir(D) + lstm_dir(D)

    w1 = _uniform(next(ks), (2 * H, 2 * H))
    proj_word = _uniform(next(ks), (2 * H, H))       # proj_word.weight^T
    proj_sent = _uniform(next(ks), (2 * H, H))       # proj_sent.weight^T
    w2 = _uniform(next(ks), (1, H))                  # W2.weight
    dec_wx = _uniform(next(ks), (H, 4 * H))          # decoder W_ih^T
    dec_wh = _uniform(next(ks), (H, 4 * H))          # decoder W_hh^T
    dec_b = _uniform(next(ks), (1, 4 * H))           # decoder bias
    w4 = _uniform(next(ks), (2 * H, H))              # W4.weight^T
    wout = _uniform(next(ks), (H, V))                # output_layer.weight^T
    bout = _uniform(next(ks), (1, V))                # output_layer.bias
    # TODO(synk): W3 of HierarchicalAttentionDecoder is never used in forward; omitted.

    dec_wxh, dec_b2 = _fuse_decoder_lstm(dec_wx, dec_wh, dec_b)

    return {
        "hidden_dim": H,
        "claim_lstm": _fuse_bilstm_weights(*claim_raw),
        "article_lstm": _fuse_bilstm_weights(*article_raw),
        "enc_dec": (w1, proj_word, proj_sent, w2, dec_wxh, dec_b2, w4, wout, bout),
    }


# ----------------------------------------------------------------------------
# full CED forward
# ----------------------------------------------------------------------------
def ced_forward(params, claim, relevant_articles, max_len):
    B, A, T_a, D = relevant_articles.shape
    H = params["hidden_dim"]

    # claim encoding -> claim_rep = cat(h_fwd, h_bwd)  (B, 2H)
    claim_rep = bilstm_final(claim, params["claim_lstm"])

    # article encoding (flatten batch x articles -> B*A independent sequences;
    # wrapper-side reshape is free HBM metadata)
    arts = relevant_articles.reshape(B * A, T_a, D)
    article_final = bilstm_final(arts, params["article_lstm"]).reshape(B, A, 2 * H)

    # fused: claim-guided attention + projections + hierarchical decoder
    generated_sequence, g_rep = attn_decoder(
        article_final, claim_rep, params["enc_dec"], max_len)
    return generated_sequence, g_rep


# ----------------------------------------------------------------------------
if __name__ == "__main__":
    input_dim, hidden_dim, vocab_size = 16, 32, 16
    B, num_articles, article_len, claim_len, max_len = 2, 4, 8, 8, 5

    key = jax.random.PRNGKey(0)
    k_p, k_c, k_a = jax.random.split(key, 3)
    params = init_params(k_p, input_dim, hidden_dim, vocab_size)

    claim = jax.random.normal(k_c, (B, claim_len, input_dim), jnp.float32)
    relevant_articles = jax.random.normal(
        k_a, (B, num_articles, article_len, input_dim), jnp.float32)

    gen, g_rep = ced_forward(params, claim, relevant_articles, max_len)
    gen = jax.block_until_ready(gen)
    g_rep = jax.block_until_ready(g_rep)

    assert gen.shape == (B, max_len, vocab_size)
    assert g_rep.shape == (B, hidden_dim)
    assert bool(jnp.all(jnp.isfinite(gen))) and bool(jnp.all(jnp.isfinite(g_rep)))
    print("KERNEL_OK")
</pallas_src>

<mosaic_0001>
module attributes {stable_mosaic.version = 11 : i64} {
  func.func @_bilstm_kernel(%arg0: i32, %arg1: memref<2x8x16xf32, #tpu.memory_space<vmem>>, %arg2: memref<16x256xf32, #tpu.memory_space<vmem>>, %arg3: memref<64x256xf32, #tpu.memory_space<vmem>>, %arg4: memref<1x256xf32, #tpu.memory_space<vmem>>, %arg5: memref<2x64xf32, #tpu.memory_space<vmem>>) attributes {dimension_semantics = [#tpu.dimension_semantics<parallel>], iteration_bounds = array<i64: 1>, scalar_prefetch = 0 : i64, scratch_operands = 0 : i64, tpu.core_type = #tpu.core_type<tc>, window_params = [{transform_indices = @transform_0, window_bounds = array<i64: 2, 8, 16>}, {pipeline_mode = #tpu.pipeline_mode<synchronous>, transform_indices = @transform_1, window_bounds = array<i64: 16, 256>}, {pipeline_mode = #tpu.pipeline_mode<synchronous>, transform_indices = @transform_2, window_bounds = array<i64: 64, 256>}, {pipeline_mode = #tpu.pipeline_mode<synchronous>, transform_indices = @transform_3, window_bounds = array<i64: 1, 256>}, {transform_indices = @transform_4, window_bounds = array<i64: 2, 64>}]} {
    %c0 = arith.constant 0 : index
    %c0_0 = arith.constant 0 : index
    %c0_1 = arith.constant 0 : index
    %0 = vector.load %arg1[%c0, %c0_0, %c0_1] : memref<2x8x16xf32, #tpu.memory_space<vmem>>, vector<2x8x16xf32>
    %1 = vector.shape_cast %0 : vector<2x8x16xf32> to vector<16x16xf32>
    %c0_2 = arith.constant 0 : index
    %c0_3 = arith.constant 0 : index
    %2 = vector.load %arg2[%c0_2, %c0_3] : memref<16x256xf32, #tpu.memory_space<vmem>>, vector<16x256xf32>
    %cst = arith.constant dense<0.000000e+00> : vector<16x256xf32>
    %3 = tpu.matmul %1, %2, %cst {dimension_numbers = #tpu.dot_dimension_numbers<[1], [0], [0], [1], [0, 0, 1, 1], [], []>} : vector<16x16xf32>, vector<16x256xf32>, vector<16x256xf32> -> vector<16x256xf32>
    %c0_4 = arith.constant 0 : index
    %c0_5 = arith.constant 0 : index
    %4 = vector.load %arg4[%c0_4, %c0_5] : memref<1x256xf32, #tpu.memory_space<vmem>>, vector<1x256xf32>
    %5 = vector.broadcast %4 : vector<1x256xf32> to vector<16x256xf32>
    %6 = arith.addf %3, %5 : vector<16x256xf32>
    %7 = vector.shape_cast %6 : vector<16x256xf32> to vector<2x8x256xf32>
    %c0_6 = arith.constant 0 : index
    %c0_7 = arith.constant 0 : index
    %8 = vector.load %arg3[%c0_6, %c0_7] : memref<64x256xf32, #tpu.memory_space<vmem>>, vector<64x256xf32>
    %cst_8 = arith.constant 0.000000e+00 : f32
    %9 = vector.broadcast %cst_8 : f32 to vector<2x64xf32>
    %cst_9 = arith.constant 0.000000e+00 : f32
    %10 = vector.broadcast %cst_9 : f32 to vector<2x32xf32>
    %cst_10 = arith.constant 0.000000e+00 : f32
    %11 = vector.broadcast %cst_10 : f32 to vector<2x32xf32>
    %12 = vector.extract_strided_slice %7 {offsets = [0, 0, 0], sizes = [2, 1, 128], strides = [1, 1, 1]} : vector<2x8x256xf32> to vector<2x1x128xf32>
    %13 = vector.shape_cast %12 : vector<2x1x128xf32> to vector<2x128xf32>
    %14 = vector.extract_strided_slice %7 {offsets = [0, 7, 128], sizes = [2, 1, 128], strides = [1, 1, 1]} : vector<2x8x256xf32> to vector<2x1x128xf32>
    %15 = vector.shape_cast %14 : vector<2x1x128xf32> to vector<2x128xf32>
    %cst_11 = arith.constant dense<0.000000e+00> : vector<2x256xf32>
    %16 = tpu.matmul %9, %8, %cst_11 {dimension_numbers = #tpu.dot_dimension_numbers<[1], [0], [0], [1], [0, 0, 1, 1], [], []>} : vector<2x64xf32>, vector<64x256xf32>, vector<2x256xf32> -> vector<2x256xf32>
    %17 = vector.extract_strided_slice %16 {offsets = [0, 0], sizes = [2, 128], strides = [1, 1]} : vector<2x256xf32> to vector<2x128xf32>
    %18 = arith.addf %13, %17 : vector<2x128xf32>
    %19 = vector.extract_strided_slice %18 {offsets = [0, 0], sizes = [2, 96], strides = [1, 1]} : vector<2x128xf32> to vector<2x96xf32>
    %20 = arith.negf %19 : vector<2x96xf32>
    %21 = math.exp %20 : vector<2x96xf32>
    %cst_12 = arith.constant 1.000000e+00 : f32
    %22 = vector.broadcast %cst_12 : f32 to vector<2x96xf32>
    %23 = arith.addf %22, %21 : vector<2x96xf32>
    %24 = arith.divf %22, %23 : vector<2x96xf32>
    %25 = vector.extract_strided_slice %18 {offsets = [0, 96], sizes = [2, 32], strides = [1, 1]} : vector<2x128xf32> to vector<2x32xf32>
    %26 = math.tanh %25 : vector<2x32xf32>
    %27 = vector.extract_strided_slice %24 {offsets = [0, 32], sizes = [2, 32], strides = [1, 1]} : vector<2x96xf32> to vector<2x32xf32>
    %28 = arith.mulf %27, %10 : vector<2x32xf32>
    %29 = vector.extract_strided_slice %24 {offsets = [0, 0], sizes = [2, 32], strides = [1, 1]} : vector<2x96xf32> to vector<2x32xf32>
    %30 = arith.mulf %29, %26 : vector<2x32xf32>
    %31 = arith.addf %28, %30 : vector<2x32xf32>
    %32 = vector.extract_strided_slice %24 {offsets = [0, 64], sizes = [2, 32], strides = [1, 1]} : vector<2x96xf32> to vector<2x32xf32>
    %33 = math.tanh %31 : vector<2x32xf32>
    %34 = arith.mulf %32, %33 : vector<2x32xf32>
    %35 = vector.extract_strided_slice %16 {offsets = [0, 128], sizes = [2, 128], strides = [1, 1]} : vector<2x256xf32> to vector<2x128xf32>
    %36 = arith.addf %15, %35 : vector<2x128xf32>
    %37 = vector.extract_strided_slice %36 {offsets = [0, 0], sizes = [2, 96], strides = [1, 1]} : vector<2x128xf32> to vector<2x96xf32>
    %38 = arith.negf %37 : vector<2x96xf32>
    %39 = math.exp %38 : vector<2x96xf32>
    %cst_13 = arith.constant 1.000000e+00 : f32
    %40 = vector.broadcast %cst_13 : f32 to vector<2x96xf32>
    %41 = arith.addf %40, %39 : vector<2x96xf32>
    %42 = arith.divf %40, %41 : vector<2x96xf32>
    %43 = vector.extract_strided_slice %36 {offsets = [0, 96], sizes = [2, 32], strides = [1, 1]} : vector<2x128xf32> to vector<2x32xf32>
    %44 = math.tanh %43 : vector<2x32xf32>
    %45 = vector.extract_strided_slice %42 {offsets = [0, 32], sizes = [2, 32], strides = [1, 1]} : vector<2x96xf32> to vector<2x32xf32>
    %46 = arith.mulf %45, %11 : vector<2x32xf32>
    %47 = vector.extract_strided_slice %42 {offsets = [0, 0], sizes = [2, 32], strides = [1, 1]} : vector<2x96xf32> to vector<2x32xf32>
    %48 = arith.mulf %47, %44 : vector<2x32xf32>
    %49 = arith.addf %46, %48 : vector<2x32xf32>
    %50 = vector.extract_strided_slice %42 {offsets = [0, 64], sizes = [2, 32], strides = [1, 1]} : vector<2x96xf32> to vector<2x32xf32>
    %51 = math.tanh %49 : vector<2x32xf32>
    %52 = arith.mulf %50, %51 : vector<2x32xf32>
    %53 = tpu.concatenate %34, %52 in 1 : vector<2x32xf32>, vector<2x32xf32> -> vector<2x64xf32>
    %54 = vector.extract_strided_slice %7 {offsets = [0, 1, 0], sizes = [2, 1, 128], strides = [1, 1, 1]} : vector<2x8x256xf32> to vector<2x1x128xf32>
    %55 = vector.shape_cast %54 : vector<2x1x128xf32> to vector<2x128xf32>
    %56 = vector.extract_strided_slice %7 {offsets = [0, 6, 128], sizes = [2, 1, 128], strides = [1, 1, 1]} : vector<2x8x256xf32> to vector<2x1x128xf32>
    %57 = vector.shape_cast %56 : vector<2x1x128xf32> to vector<2x128xf32>
    %cst_14 = arith.constant dense<0.000000e+00> : vector<2x256xf32>
    %58 = tpu.matmul %53, %8, %cst_14 {dimension_numbers = #tpu.dot_dimension_numbers<[1], [0], [0], [1], [0, 0, 1, 1], [], []>} : vector<2x64xf32>, vector<64x256xf32>, vector<2x256xf32> -> vector<2x256xf32>
    %59 = vector.extract_strided_slice %58 {offsets = [0, 0], sizes = [2, 128], strides = [1, 1]} : vector<2x256xf32> to vector<2x128xf32>
    %60 = arith.addf %55, %59 : vector<2x128xf32>
    %61 = vector.extract_strided_slice %60 {offsets = [0, 0], sizes = [2, 96], strides = [1, 1]} : vector<2x128xf32> to vector<2x96xf32>
    %62 = arith.negf %61 : vector<2x96xf32>
    %63 = math.exp %62 : vector<2x96xf32>
    %cst_15 = arith.constant 1.000000e+00 : f32
    %64 = vector.broadcast %cst_15 : f32 to vector<2x96xf32>
    %65 = arith.addf %64, %63 : vector<2x96xf32>
    %66 = arith.divf %64, %65 : vector<2x96xf32>
    %67 = vector.extract_strided_slice %60 {offsets = [0, 96], sizes = [2, 32], strides = [1, 1]} : vector<2x128xf32> to vector<2x32xf32>
    %68 = math.tanh %67 : vector<2x32xf32>
    %69 = vector.extract_strided_slice %66 {offsets = [0, 32], sizes = [2, 32], strides = [1, 1]} : vector<2x96xf32> to vector<2x32xf32>
    %70 = arith.mulf %69, %31 : vector<2x32xf32>
    %71 = vector.extract_strided_slice %66 {offsets = [0, 0], sizes = [2, 32], strides = [1, 1]} : vector<2x96xf32> to vector<2x32xf32>
    %72 = arith.mulf %71, %68 : vector<2x32xf32>
    %73 = arith.addf %70, %72 : vector<2x32xf32>
    %74 = vector.extract_strided_slice %66 {offsets = [0, 64], sizes = [2, 32], strides = [1, 1]} : vector<2x96xf32> to vector<2x32xf32>
    %75 = math.tanh %73 : vector<2x32xf32>
    %76 = arith.mulf %74, %75 : vector<2x32xf32>
    %77 = vector.extract_strided_slice %58 {offsets = [0, 128], sizes = [2, 128], strides = [1, 1]} : vector<2x256xf32> to vector<2x128xf32>
    %78 = arith.addf %57, %77 : vector<2x128xf32>
    %79 = vector.extract_strided_slice %78 {offsets = [0, 0], sizes = [2, 96], strides = [1, 1]} : vector<2x128xf32> to vector<2x96xf32>
    %80 = arith.negf %79 : vector<2x96xf32>
    %81 = math.exp %80 : vector<2x96xf32>
    %cst_16 = arith.constant 1.000000e+00 : f32
    %82 = vector.broadcast %cst_16 : f32 to vector<2x96xf32>
    %83 = arith.addf %82, %81 : vector<2x96xf32>
    %84 = arith.divf %82, %83 : vector<2x96xf32>
    %85 = vector.extract_strided_slice %78 {offsets = [0, 96], sizes = [2, 32], strides = [1, 1]} : vector<2x128xf32> to vector<2x32xf32>
    %86 = math.tanh %85 : vector<2x32xf32>
    %87 = vector.extract_strided_slice %84 {offsets = [0, 32], sizes = [2, 32], strides = [1, 1]} : vector<2x96xf32> to vector<2x32xf32>
    %88 = arith.mulf %87, %49 : vector<2x32xf32>
    %89 = vector.extract_strided_slice %84 {offsets = [0, 0], sizes = [2, 32], strides = [1, 1]} : vector<2x96xf32> to vector<2x32xf32>
    %90 = arith.mulf %89, %86 : vector<2x32xf32>
    %91 = arith.addf %88, %90 : vector<2x32xf32>
    %92 = vector.extract_strided_slice %84 {offsets = [0, 64], sizes = [2, 32], strides = [1, 1]} : vector<2x96xf32> to vector<2x32xf32>
    %93 = math.tanh %91 : vector<2x32xf32>
    %94 = arith.mulf %92, %93 : vector<2x32xf32>
    %95 = tpu.concatenate %76, %94 in 1 : vector<2x32xf32>, vector<2x32xf32> -> vector<2x64xf32>
    %96 = vector.extract_strided_slice %7 {offsets = [0, 2, 0], sizes = [2, 1, 128], strides = [1, 1, 1]} : vector<2x8x256xf32> to vector<2x1x128xf32>
    %97 = vector.shape_cast %96 : vector<2x1x128xf32> to vector<2x128xf32>
    %98 = vector.extract_strided_slice %7 {offsets = [0, 5, 128], sizes = [2, 1, 128], strides = [1, 1, 1]} : vector<2x8x256xf32> to vector<2x1x128xf32>
    %99 = vector.shape_cast %98 : vector<2x1x128xf32> to vector<2x128xf32>
    %cst_17 = arith.constant dense<0.000000e+00> : vector<2x256xf32>
    %100 = tpu.matmul %95, %8, %cst_17 {dimension_numbers = #tpu.dot_dimension_numbers<[1], [0], [0], [1], [0, 0, 1, 1], [], []>} : vector<2x64xf32>, vector<64x256xf32>, vector<2x256xf32> -> vector<2x256xf32>
    %101 = vector.extract_strided_slice %100 {offsets = [0, 0], sizes = [2, 128], strides = [1, 1]} : vector<2x256xf32> to vector<2x128xf32>
    %102 = arith.addf %97, %101 : vector<2x128xf32>
    %103 = vector.extract_strided_slice %102 {offsets = [0, 0], sizes = [2, 96], strides = [1, 1]} : vector<2x128xf32> to vector<2x96xf32>
    %104 = arith.negf %103 : vector<2x96xf32>
    %105 = math.exp %104 : vector<2x96xf32>
    %cst_18 = arith.constant 1.000000e+00 : f32
    %106 = vector.broadcast %cst_18 : f32 to vector<2x96xf32>
    %107 = arith.addf %106, %105 : vector<2x96xf32>
    %108 = arith.divf %106, %107 : vector<2x96xf32>
    %109 = vector.extract_strided_slice %102 {offsets = [0, 96], sizes = [2, 32], strides = [1, 1]} : vector<2x128xf32> to vector<2x32xf32>
    %110 = math.tanh %109 : vector<2x32xf32>
    %111 = vector.extract_strided_slice %108 {offsets = [0, 32], sizes = [2, 32], strides = [1, 1]} : vector<2x96xf32> to vector<2x32xf32>
    %112 = arith.mulf %111, %73 : vector<2x32xf32>
    %113 = vector.extract_strided_slice %108 {offsets = [0, 0], sizes = [2, 32], strides = [1, 1]} : vector<2x96xf32> to vector<2x32xf32>
    %114 = arith.mulf %113, %110 : vector<2x32xf32>
    %115 = arith.addf %112, %114 : vector<2x32xf32>
    %116 = vector.extract_strided_slice %108 {offsets = [0, 64], sizes = [2, 32], strides = [1, 1]} : vector<2x96xf32> to vector<2x32xf32>
    %117 = math.tanh %115 : vector<2x32xf32>
    %118 = arith.mulf %116, %117 : vector<2x32xf32>
    %119 = vector.extract_strided_slice %100 {offsets = [0, 128], sizes = [2, 128], strides = [1, 1]} : vector<2x256xf32> to vector<2x128xf32>
    %120 = arith.addf %99, %119 : vector<2x128xf32>
    %121 = vector.extract_strided_slice %120 {offsets = [0, 0], sizes = [2, 96], strides = [1, 1]} : vector<2x128xf32> to vector<2x96xf32>
    %122 = arith.negf %121 : vector<2x96xf32>
    %123 = math.exp %122 : vector<2x96xf32>
    %cst_19 = arith.constant 1.000000e+00 : f32
    %124 = vector.broadcast %cst_19 : f32 to vector<2x96xf32>
    %125 = arith.addf %124, %123 : vector<2x96xf32>
    %126 = arith.divf %124, %125 : vector<2x96xf32>
    %127 = vector.extract_strided_slice %120 {offsets = [0, 96], sizes = [2, 32], strides = [1, 1]} : vector<2x128xf32> to vector<2x32xf32>
    %128 = math.tanh %127 : vector<2x32xf32>
    %129 = vector.extract_strided_slice %126 {offsets = [0, 32], sizes = [2, 32], strides = [1, 1]} : vector<2x96xf32> to vector<2x32xf32>
    %130 = arith.mulf %129, %91 : vector<2x32xf32>
    %131 = vector.extract_strided_slice %126 {offsets = [0, 0], sizes = [2, 32], strides = [1, 1]} : vector<2x96xf32> to vector<2x32xf32>
    %132 = arith.mulf %131, %128 : vector<2x32xf32>
    %133 = arith.addf %130, %132 : vector<2x32xf32>
    %134 = vector.extract_strided_slice %126 {offsets = [0, 64], sizes = [2, 32], strides = [1, 1]} : vector<2x96xf32> to vector<2x32xf32>
    %135 = math.tanh %133 : vector<2x32xf32>
    %136 = arith.mulf %134, %135 : vector<2x32xf32>
    %137 = tpu.concatenate %118, %136 in 1 : vector<2x32xf32>, vector<2x32xf32> -> vector<2x64xf32>
    %138 = vector.extract_strided_slice %7 {offsets = [0, 3, 0], sizes = [2, 1, 128], strides = [1, 1, 1]} : vector<2x8x256xf32> to vector<2x1x128xf32>
    %139 = vector.shape_cast %138 : vector<2x1x128xf32> to vector<2x128xf32>
    %140 = vector.extract_strided_slice %7 {offsets = [0, 4, 128], sizes = [2, 1, 128], strides = [1, 1, 1]} : vector<2x8x256xf32> to vector<2x1x128xf32>
    %141 = vector.shape_cast %140 : vector<2x1x128xf32> to vector<2x128xf32>
    %cst_20 = arith.constant dense<0.000000e+00> : vector<2x256xf32>
    %142 = tpu.matmul %137, %8, %cst_20 {dimension_numbers = #tpu.dot_dimension_numbers<[1], [0], [0], [1], [0, 0, 1, 1], [], []>} : vector<2x64xf32>, vector<64x256xf32>, vector<2x256xf32> -> vector<2x256xf32>
    %143 = vector.extract_strided_slice %142 {offsets = [0, 0], sizes = [2, 128], strides = [1, 1]} : vector<2x256xf32> to vector<2x128xf32>
    %144 = arith.addf %139, %143 : vector<2x128xf32>
    %145 = vector.extract_strided_slice %144 {offsets = [0, 0], sizes = [2, 96], strides = [1, 1]} : vector<2x128xf32> to vector<2x96xf32>
    %146 = arith.negf %145 : vector<2x96xf32>
    %147 = math.exp %146 : vector<2x96xf32>
    %cst_21 = arith.constant 1.000000e+00 : f32
    %148 = vector.broadcast %cst_21 : f32 to vector<2x96xf32>
    %149 = arith.addf %148, %147 : vector<2x96xf32>
    %150 = arith.divf %148, %149 : vector<2x96xf32>
    %151 = vector.extract_strided_slice %144 {offsets = [0, 96], sizes = [2, 32], strides = [1, 1]} : vector<2x128xf32> to vector<2x32xf32>
    %152 = math.tanh %151 : vector<2x32xf32>
    %153 = vector.extract_strided_slice %150 {offsets = [0, 32], sizes = [2, 32], strides = [1, 1]} : vector<2x96xf32> to vector<2x32xf32>
    %154 = arith.mulf %153, %115 : vector<2x32xf32>
    %155 = vector.extract_strided_slice %150 {offsets = [0, 0], sizes = [2, 32], strides = [1, 1]} : vector<2x96xf32> to vector<2x32xf32>
    %156 = arith.mulf %155, %152 : vector<2x32xf32>
    %157 = arith.addf %154, %156 : vector<2x32xf32>
    %158 = vector.extract_strided_slice %150 {offsets = [0, 64], sizes = [2, 32], strides = [1, 1]} : vector<2x96xf32> to vector<2x32xf32>
    %159 = math.tanh %157 : vector<2x32xf32>
    %160 = arith.mulf %158, %159 : vector<2x32xf32>
    %161 = vector.extract_strided_slice %142 {offsets = [0, 128], sizes = [2, 128], strides = [1, 1]} : vector<2x256xf32> to vector<2x128xf32>
    %162 = arith.addf %141, %161 : vector<2x128xf32>
    %163 = vector.extract_strided_slice %162 {offsets = [0, 0], sizes = [2, 96], strides = [1, 1]} : vector<2x128xf32> to vector<2x96xf32>
    %164 = arith.negf %163 : vector<2x96xf32>
    %165 = math.exp %164 : vector<2x96xf32>
    %cst_22 = arith.constant 1.000000e+00 : f32
    %166 = vector.broadcast %cst_22 : f32 to vector<2x96xf32>
    %167 = arith.addf %166, %165 : vector<2x96xf32>
    %168 = arith.divf %166, %167 : vector<2x96xf32>
    %169 = vector.extract_strided_slice %162 {offsets = [0, 96], sizes = [2, 32], strides = [1, 1]} : vector<2x128xf32> to vector<2x32xf32>
    %170 = math.tanh %169 : vector<2x32xf32>
    %171 = vector.extract_strided_slice %168 {offsets = [0, 32], sizes = [2, 32], strides = [1, 1]} : vector<2x96xf32> to vector<2x32xf32>
    %172 = arith.mulf %171, %133 : vector<2x32xf32>
    %173 = vector.extract_strided_slice %168 {offsets = [0, 0], sizes = [2, 32], strides = [1, 1]} : vector<2x96xf32> to vector<2x32xf32>
    %174 = arith.mulf %173, %170 : vector<2x32xf32>
    %175 = arith.addf %172, %174 : vector<2x32xf32>
    %176 = vector.extract_strided_slice %168 {offsets = [0, 64], sizes = [2, 32], strides = [1, 1]} : vector<2x96xf32> to vector<2x32xf32>
    %177 = math.tanh %175 : vector<2x32xf32>
    %178 = arith.mulf %176, %177 : vector<2x32xf32>
    %179 = tpu.concatenate %160, %178 in 1 : vector<2x32xf32>, vector<2x32xf32> -> vector<2x64xf32>
    %180 = vector.extract_strided_slice %7 {offsets = [0, 4, 0], sizes = [2, 1, 128], strides = [1, 1, 1]} : vector<2x8x256xf32> to vector<2x1x128xf32>
    %181 = vector.shape_cast %180 : vector<2x1x128xf32> to vector<2x128xf32>
    %182 = vector.extract_strided_slice %7 {offsets = [0, 3, 128], sizes = [2, 1, 128], strides = [1, 1, 1]} : vector<2x8x256xf32> to vector<2x1x128xf32>
    %183 = vector.shape_cast %182 : vector<2x1x128xf32> to vector<2x128xf32>
    %cst_23 = arith.constant dense<0.000000e+00> : vector<2x256xf32>
    %184 = tpu.matmul %179, %8, %cst_23 {dimension_numbers = #tpu.dot_dimension_numbers<[1], [0], [0], [1], [0, 0, 1, 1], [], []>} : vector<2x64xf32>, vector<64x256xf32>, vector<2x256xf32> -> vector<2x256xf32>
    %185 = vector.extract_strided_slice %184 {offsets = [0, 0], sizes = [2, 128], strides = [1, 1]} : vector<2x256xf32> to vector<2x128xf32>
    %186 = arith.addf %181, %185 : vector<2x128xf32>
    %187 = vector.extract_strided_slice %186 {offsets = [0, 0], sizes = [2, 96], strides = [1, 1]} : vector<2x128xf32> to vector<2x96xf32>
    %188 = arith.negf %187 : vector<2x96xf32>
    %189 = math.exp %188 : vector<2x96xf32>
    %cst_24 = arith.constant 1.000000e+00 : f32
    %190 = vector.broadcast %cst_24 : f32 to vector<2x96xf32>
    %191 = arith.addf %190, %189 : vector<2x96xf32>
    %192 = arith.divf %190, %191 : vector<2x96xf32>
    %193 = vector.extract_strided_slice %186 {offsets = [0, 96], sizes = [2, 32], strides = [1, 1]} : vector<2x128xf32> to vector<2x32xf32>
    %194 = math.tanh %193 : vector<2x32xf32>
    %195 = vector.extract_strided_slice %192 {offsets = [0, 32], sizes = [2, 32], strides = [1, 1]} : vector<2x96xf32> to vector<2x32xf32>
    %196 = arith.mulf %195, %157 : vector<2x32xf32>
    %197 = vector.extract_strided_slice %192 {offsets = [0, 0], sizes = [2, 32], strides = [1, 1]} : vector<2x96xf32> to vector<2x32xf32>
    %198 = arith.mulf %197, %194 : vector<2x32xf32>
    %199 = arith.addf %196, %198 : vector<2x32xf32>
    %200 = vector.extract_strided_slice %192 {offsets = [0, 64], sizes = [2, 32], strides = [1, 1]} : vector<2x96xf32> to vector<2x32xf32>
    %201 = math.tanh %199 : vector<2x32xf32>
    %202 = arith.mulf %200, %201 : vector<2x32xf32>
    %203 = vector.extract_strided_slice %184 {offsets = [0, 128], sizes = [2, 128], strides = [1, 1]} : vector<2x256xf32> to vector<2x128xf32>
    %204 = arith.addf %183, %203 : vector<2x128xf32>
    %205 = vector.extract_strided_slice %204 {offsets = [0, 0], sizes = [2, 96], strides = [1, 1]} : vector<2x128xf32> to vector<2x96xf32>
    %206 = arith.negf %205 : vector<2x96xf32>
    %207 = math.exp %206 : vector<2x96xf32>
    %cst_25 = arith.constant 1.000000e+00 : f32
    %208 = vector.broadcast %cst_25 : f32 to vector<2x96xf32>
    %209 = arith.addf %208, %207 : vector<2x96xf32>
    %210 = arith.divf %208, %209 : vector<2x96xf32>
    %211 = vector.extract_strided_slice %204 {offsets = [0, 96], sizes = [2, 32], strides = [1, 1]} : vector<2x128xf32> to vector<2x32xf32>
    %212 = math.tanh %211 : vector<2x32xf32>
    %213 = vector.extract_strided_slice %210 {offsets = [0, 32], sizes = [2, 32], strides = [1, 1]} : vector<2x96xf32> to vector<2x32xf32>
    %214 = arith.mulf %213, %175 : vector<2x32xf32>
    %215 = vector.extract_strided_slice %210 {offsets = [0, 0], sizes = [2, 32], strides = [1, 1]} : vector<2x96xf32> to vector<2x32xf32>
    %216 = arith.mulf %215, %212 : vector<2x32xf32>
    %217 = arith.addf %214, %216 : vector<2x32xf32>
    %218 = vector.extract_strided_slice %210 {offsets = [0, 64], sizes = [2, 32], strides = [1, 1]} : vector<2x96xf32> to vector<2x32xf32>
    %219 = math.tanh %217 : vector<2x32xf32>
    %220 = arith.mulf %218, %219 : vector<2x32xf32>
    %221 = tpu.concatenate %202, %220 in 1 : vector<2x32xf32>, vector<2x32xf32> -> vector<2x64xf32>
    %222 = vector.extract_strided_slice %7 {offsets = [0, 5, 0], sizes = [2, 1, 128], strides = [1, 1, 1]} : vector<2x8x256xf32> to vector<2x1x128xf32>
    %223 = vector.shape_cast %222 : vector<2x1x128xf32> to vector<2x128xf32>
    %224 = vector.extract_strided_slice %7 {offsets = [0, 2, 128], sizes = [2, 1, 128], strides = [1, 1, 1]} : vector<2x8x256xf32> to vector<2x1x128xf32>
    %225 = vector.shape_cast %224 : vector<2x1x128xf32> to vector<2x128xf32>
    %cst_26 = arith.constant dense<0.000000e+00> : vector<2x256xf32>
    %226 = tpu.matmul %221, %8, %cst_26 {dimension_numbers = #tpu.dot_dimension_numbers<[1], [0], [0], [1], [0, 0, 1, 1], [], []>} : vector<2x64xf32>, vector<64x256xf32>, vector<2x256xf32> -> vector<2x256xf32>
    %227 = vector.extract_strided_slice %226 {offsets = [0, 0], sizes = [2, 128], strides = [1, 1]} : vector<2x256xf32> to vector<2x128xf32>
    %228 = arith.addf %223, %227 : vector<2x128xf32>
    %229 = vector.extract_strided_slice %228 {offsets = [0, 0], sizes = [2, 96], strides = [1, 1]} : vector<2x128xf32> to vector<2x96xf32>
    %230 = arith.negf %229 : vector<2x96xf32>
    %231 = math.exp %230 : vector<2x96xf32>
    %cst_27 = arith.constant 1.000000e+00 : f32
    %232 = vector.broadcast %cst_27 : f32 to vector<2x96xf32>
    %233 = arith.addf %232, %231 : vector<2x96xf32>
    %234 = arith.divf %232, %233 : vector<2x96xf32>
    %235 = vector.extract_strided_slice %228 {offsets = [0, 96], sizes = [2, 32], strides = [1, 1]} : vector<2x128xf32> to vector<2x32xf32>
    %236 = math.tanh %235 : vector<2x32xf32>
    %237 = vector.extract_strided_slice %234 {offsets = [0, 32], sizes = [2, 32], strides = [1, 1]} : vector<2x96xf32> to vector<2x32xf32>
    %238 = arith.mulf %237, %199 : vector<2x32xf32>
    %239 = vector.extract_strided_slice %234 {offsets = [0, 0], sizes = [2, 32], strides = [1, 1]} : vector<2x96xf32> to vector<2x32xf32>
    %240 = arith.mulf %239, %236 : vector<2x32xf32>
    %241 = arith.addf %238, %240 : vector<2x32xf32>
    %242 = vector.extract_strided_slice %234 {offsets = [0, 64], sizes = [2, 32], strides = [1, 1]} : vector<2x96xf32> to vector<2x32xf32>
    %243 = math.tanh %241 : vector<2x32xf32>
    %244 = arith.mulf %242, %243 : vector<2x32xf32>
    %245 = vector.extract_strided_slice %226 {offsets = [0, 128], sizes = [2, 128], strides = [1, 1]} : vector<2x256xf32> to vector<2x128xf32>
    %246 = arith.addf %225, %245 : vector<2x128xf32>
    %247 = vector.extract_strided_slice %246 {offsets = [0, 0], sizes = [2, 96], strides = [1, 1]} : vector<2x128xf32> to vector<2x96xf32>
    %248 = arith.negf %247 : vector<2x96xf32>
    %249 = math.exp %248 : vector<2x96xf32>
    %cst_28 = arith.constant 1.000000e+00 : f32
    %250 = vector.broadcast %cst_28 : f32 to vector<2x96xf32>
    %251 = arith.addf %250, %249 : vector<2x96xf32>
    %252 = arith.divf %250, %251 : vector<2x96xf32>
    %253 = vector.extract_strided_slice %246 {offsets = [0, 96], sizes = [2, 32], strides = [1, 1]} : vector<2x128xf32> to vector<2x32xf32>
    %254 = math.tanh %253 : vector<2x32xf32>
    %255 = vector.extract_strided_slice %252 {offsets = [0, 32], sizes = [2, 32], strides = [1, 1]} : vector<2x96xf32> to vector<2x32xf32>
    %256 = arith.mulf %255, %217 : vector<2x32xf32>
    %257 = vector.extract_strided_slice %252 {offsets = [0, 0], sizes = [2, 32], strides = [1, 1]} : vector<2x96xf32> to vector<2x32xf32>
    %258 = arith.mulf %257, %254 : vector<2x32xf32>
    %259 = arith.addf %256, %258 : vector<2x32xf32>
    %260 = vector.extract_strided_slice %252 {offsets = [0, 64], sizes = [2, 32], strides = [1, 1]} : vector<2x96xf32> to vector<2x32xf32>
    %261 = math.tanh %259 : vector<2x32xf32>
    %262 = arith.mulf %260, %261 : vector<2x32xf32>
    %263 = tpu.concatenate %244, %262 in 1 : vector<2x32xf32>, vector<2x32xf32> -> vector<2x64xf32>
    %264 = vector.extract_strided_slice %7 {offsets = [0, 6, 0], sizes = [2, 1, 128], strides = [1, 1, 1]} : vector<2x8x256xf32> to vector<2x1x128xf32>
    %265 = vector.shape_cast %264 : vector<2x1x128xf32> to vector<2x128xf32>
    %266 = vector.extract_strided_slice %7 {offsets = [0, 1, 128], sizes = [2, 1, 128], strides = [1, 1, 1]} : vector<2x8x256xf32> to vector<2x1x128xf32>
    %267 = vector.shape_cast %266 : vector<2x1x128xf32> to vector<2x128xf32>
    %cst_29 = arith.constant dense<0.000000e+00> : vector<2x256xf32>
    %268 = tpu.matmul %263, %8, %cst_29 {dimension_numbers = #tpu.dot_dimension_numbers<[1], [0], [0], [1], [0, 0, 1, 1], [], []>} : vector<2x64xf32>, vector<64x256xf32>, vector<2x256xf32> -> vector<2x256xf32>
    %269 = vector.extract_strided_slice %268 {offsets = [0, 0], sizes = [2, 128], strides = [1, 1]} : vector<2x256xf32> to vector<2x128xf32>
    %270 = arith.addf %265, %269 : vector<2x128xf32>
    %271 = vector.extract_strided_slice %270 {offsets = [0, 0], sizes = [2, 96], strides = [1, 1]} : vector<2x128xf32> to vector<2x96xf32>
    %272 = arith.negf %271 : vector<2x96xf32>
    %273 = math.exp %272 : vector<2x96xf32>
    %cst_30 = arith.constant 1.000000e+00 : f32
    %274 = vector.broadcast %cst_30 : f32 to vector<2x96xf32>
    %275 = arith.addf %274, %273 : vector<2x96xf32>
    %276 = arith.divf %274, %275 : vector<2x96xf32>
    %277 = vector.extract_strided_slice %270 {offsets = [0, 96], sizes = [2, 32], strides = [1, 1]} : vector<2x128xf32> to vector<2x32xf32>
    %278 = math.tanh %277 : vector<2x32xf32>
    %279 = vector.extract_strided_slice %276 {offsets = [0, 32], sizes = [2, 32], strides = [1, 1]} : vector<2x96xf32> to vector<2x32xf32>
    %280 = arith.mulf %279, %241 : vector<2x32xf32>
    %281 = vector.extract_strided_slice %276 {offsets = [0, 0], sizes = [2, 32], strides = [1, 1]} : vector<2x96xf32> to vector<2x32xf32>
    %282 = arith.mulf %281, %278 : vector<2x32xf32>
    %283 = arith.addf %280, %282 : vector<2x32xf32>
    %284 = vector.extract_strided_slice %276 {offsets = [0, 64], sizes = [2, 32], strides = [1, 1]} : vector<2x96xf32> to vector<2x32xf32>
    %285 = math.tanh %283 : vector<2x32xf32>
    %286 = arith.mulf %284, %285 : vector<2x32xf32>
    %287 = vector.extract_strided_slice %268 {offsets = [0, 128], sizes = [2, 128], strides = [1, 1]} : vector<2x256xf32> to vector<2x128xf32>
    %288 = arith.addf %267, %287 : vector<2x128xf32>
    %289 = vector.extract_strided_slice %288 {offsets = [0, 0], sizes = [2, 96], strides = [1, 1]} : vector<2x128xf32> to vector<2x96xf32>
    %290 = arith.negf %289 : vector<2x96xf32>
    %291 = math.exp %290 : vector<2x96xf32>
    %cst_31 = arith.constant 1.000000e+00 : f32
    %292 = vector.broadcast %cst_31 : f32 to vector<2x96xf32>
    %293 = arith.addf %292, %291 : vector<2x96xf32>
    %294 = arith.divf %292, %293 : vector<2x96xf32>
    %295 = vector.extract_strided_slice %288 {offsets = [0, 96], sizes = [2, 32], strides = [1, 1]} : vector<2x128xf32> to vector<2x32xf32>
    %296 = math.tanh %295 : vector<2x32xf32>
    %297 = vector.extract_strided_slice %294 {offsets = [0, 32], sizes = [2, 32], strides = [1, 1]} : vector<2x96xf32> to vector<2x32xf32>
    %298 = arith.mulf %297, %259 : vector<2x32xf32>
    %299 = vector.extract_strided_slice %294 {offsets = [0, 0], sizes = [2, 32], strides = [1, 1]} : vector<2x96xf32> to vector<2x32xf32>
    %300 = arith.mulf %299, %296 : vector<2x32xf32>
    %301 = arith.addf %298, %300 : vector<2x32xf32>
    %302 = vector.extract_strided_slice %294 {offsets = [0, 64], sizes = [2, 32], strides = [1, 1]} : vector<2x96xf32> to vector<2x32xf32>
    %303 = math.tanh %301 : vector<2x32xf32>
    %304 = arith.mulf %302, %303 : vector<2x32xf32>
    %305 = tpu.concatenate %286, %304 in 1 : vector<2x32xf32>, vector<2x32xf32> -> vector<2x64xf32>
    %306 = vector.extract_strided_slice %7 {offsets = [0, 7, 0], sizes = [2, 1, 128], strides = [1, 1, 1]} : vector<2x8x256xf32> to vector<2x1x128xf32>
    %307 = vector.shape_cast %306 : vector<2x1x128xf32> to vector<2x128xf32>
    %308 = vector.extract_strided_slice %7 {offsets = [0, 0, 128], sizes = [2, 1, 128], strides = [1, 1, 1]} : vector<2x8x256xf32> to vector<2x1x128xf32>
    %309 = vector.shape_cast %308 : vector<2x1x128xf32> to vector<2x128xf32>
    %cst_32 = arith.constant dense<0.000000e+00> : vector<2x256xf32>
    %310 = tpu.matmul %305, %8, %cst_32 {dimension_numbers = #tpu.dot_dimension_numbers<[1], [0], [0], [1], [0, 0, 1, 1], [], []>} : vector<2x64xf32>, vector<64x256xf32>, vector<2x256xf32> -> vector<2x256xf32>
    %311 = vector.extract_strided_slice %310 {offsets = [0, 0], sizes = [2, 128], strides = [1, 1]} : vector<2x256xf32> to vector<2x128xf32>
    %312 = arith.addf %307, %311 : vector<2x128xf32>
    %313 = vector.extract_strided_slice %312 {offsets = [0, 0], sizes = [2, 96], strides = [1, 1]} : vector<2x128xf32> to vector<2x96xf32>
    %314 = arith.negf %313 : vector<2x96xf32>
    %315 = math.exp %314 : vector<2x96xf32>
    %cst_33 = arith.constant 1.000000e+00 : f32
    %316 = vector.broadcast %cst_33 : f32 to vector<2x96xf32>
    %317 = arith.addf %316, %315 : vector<2x96xf32>
    %318 = arith.divf %316, %317 : vector<2x96xf32>
    %319 = vector.extract_strided_slice %312 {offsets = [0, 96], sizes = [2, 32], strides = [1, 1]} : vector<2x128xf32> to vector<2x32xf32>
    %320 = math.tanh %319 : vector<2x32xf32>
    %321 = vector.extract_strided_slice %318 {offsets = [0, 32], sizes = [2, 32], strides = [1, 1]} : vector<2x96xf32> to vector<2x32xf32>
    %322 = arith.mulf %321, %283 : vector<2x32xf32>
    %323 = vector.extract_strided_slice %318 {offsets = [0, 0], sizes = [2, 32], strides = [1, 1]} : vector<2x96xf32> to vector<2x32xf32>
    %324 = arith.mulf %323, %320 : vector<2x32xf32>
    %325 = arith.addf %322, %324 : vector<2x32xf32>
    %326 = vector.extract_strided_slice %318 {offsets = [0, 64], sizes = [2, 32], strides = [1, 1]} : vector<2x96xf32> to vector<2x32xf32>
    %327 = math.tanh %325 : vector<2x32xf32>
    %328 = arith.mulf %326, %327 : vector<2x32xf32>
    %329 = vector.extract_strided_slice %310 {offsets = [0, 128], sizes = [2, 128], strides = [1, 1]} : vector<2x256xf32> to vector<2x128xf32>
    %330 = arith.addf %309, %329 : vector<2x128xf32>
    %331 = vector.extract_strided_slice %330 {offsets = [0, 0], sizes = [2, 96], strides = [1, 1]} : vector<2x128xf32> to vector<2x96xf32>
    %332 = arith.negf %331 : vector<2x96xf32>
    %333 = math.exp %332 : vector<2x96xf32>
    %cst_34 = arith.constant 1.000000e+00 : f32
    %334 = vector.broadcast %cst_34 : f32 to vector<2x96xf32>
    %335 = arith.addf %334, %333 : vector<2x96xf32>
    %336 = arith.divf %334, %335 : vector<2x96xf32>
    %337 = vector.extract_strided_slice %330 {offsets = [0, 96], sizes = [2, 32], strides = [1, 1]} : vector<2x128xf32> to vector<2x32xf32>
    %338 = math.tanh %337 : vector<2x32xf32>
    %339 = vector.extract_strided_slice %336 {offsets = [0, 32], sizes = [2, 32], strides = [1, 1]} : vector<2x96xf32> to vector<2x32xf32>
    %340 = arith.mulf %339, %301 : vector<2x32xf32>
    %341 = vector.extract_strided_slice %336 {offsets = [0, 0], sizes = [2, 32], strides = [1, 1]} : vector<2x96xf32> to vector<2x32xf32>
    %342 = arith.mulf %341, %338 : vector<2x32xf32>
    %343 = arith.addf %340, %342 : vector<2x32xf32>
    %344 = vector.extract_strided_slice %336 {offsets = [0, 64], sizes = [2, 32], strides = [1, 1]} : vector<2x96xf32> to vector<2x32xf32>
    %345 = math.tanh %343 : vector<2x32xf32>
    %346 = arith.mulf %344, %345 : vector<2x32xf32>
    %347 = tpu.concatenate %328, %346 in 1 : vector<2x32xf32>, vector<2x32xf32> -> vector<2x64xf32>
    %c0_35 = arith.constant 0 : index
    %c0_36 = arith.constant 0 : index
    %348 = vector.load %arg5[%c0_35, %c0_36] : memref<2x64xf32, #tpu.memory_space<vmem>>, vector<2x64xf32>
    tpu.vector_store %arg5[%c0_35, %c0_36], %347 {strides = array<i32>} : memref<2x64xf32, #tpu.memory_space<vmem>>, vector<2x64xf32>,
    return
  }
  func.func @transform_0(%arg0: i32) -> (i32, i32, i32) {
    %c0_i32 = arith.constant 0 : i32
    %c0_i32_0 = arith.constant 0 : i32
    %c0_i32_1 = arith.constant 0 : i32
    return %arg0, %c0_i32, %c0_i32_0 : i32, i32, i32
  }
  func.func @transform_1(%arg0: i32) -> (i32, i32) {
    %c0_i32 = arith.constant 0 : i32
    %c0_i32_0 = arith.constant 0 : i32
    %c0_i32_1 = arith.constant 0 : i32
    return %c0_i32, %c0_i32_0 : i32, i32
  }
  func.func @transform_2(%arg0: i32) -> (i32, i32) {
    %c0_i32 = arith.constant 0 : i32
    %c0_i32_0 = arith.constant 0 : i32
    %c0_i32_1 = arith.constant 0 : i32
    return %c0_i32, %c0_i32_0 : i32, i32
  }
  func.func @transform_3(%arg0: i32) -> (i32, i32) {
    %c0_i32 = arith.constant 0 : i32
    %c0_i32_0 = arith.constant 0 : i32
    %c0_i32_1 = arith.constant 0 : i32
    return %c0_i32, %c0_i32_0 : i32, i32
  }
  func.func @transform_4(%arg0: i32) -> (i32, i32) {
    %c0_i32 = arith.constant 0 : i32
    %c0_i32_0 = arith.constant 0 : i32
    return %arg0, %c0_i32 : i32, i32
  }
}

</mosaic_0001>

<bundles_post_ra>
// kernel: tpu_custom_call.1
= control target key start
LH: loop header
LB: loop body
LE: loop exit
PB: predicated region body
PF: predicated region fallthrough
CT: control target
= control target key end

     0   :  { %9 = vsyncpa [#allocation3], 0  ;;  %s2899_s0 = inlined_call_operand.hbm [shape: f32[2,8,16], index: 0, kind: input, shape index: {}]   ;;  %s2900_s1 = inlined_call_operand.hbm [shape: f32[16,256], index: 1, kind: input, shape index: {}]   ;;  %s2901_s2 = inlined_call_operand.hbm [shape: f32[64,256], index: 2, kind: input, shape index: {}]   ;;  %s2902_s3 = inlined_call_operand.vmem [shape: f32[1,256], index: 3, kind: input, shape index: {}]   ;;  %s2903_s4 = inlined_call_operand.hbm [shape: f32[2,64], index: 4, kind: output, shape index: {}]  }
   0x1   :  { %10 = vsyncpa [#allocation6], 0 }
   0x2   :  { %11 = vsyncpa [#allocation4], 0  ;;  %s2430_s15 = smov [#allocation5]   ;;  %s2336_s19 = scalar_lea.hbm %s2900_s1, 512 }
   0x3   :  { %s29_s16 = sshll.u32 %s2430_s15, 4  ;;  %p2337_p0 = scmp.ne.s32.totalorder %s2900_s1, %s2336_s19  ;;  %s30_s16 = int_to_ptr.vmem [resolvable:$true] %s29_s16 }
   0x4   :  { %p2340_p1 = scmp.lt.u32.totalorder %s2336_s19, %s2900_s1 }
   0x6   :  { %p2342_p2 = pnand %p2340_p1, %p2337_p0 }
   0x8   :  { %2345 = shalt.err (!%p2342_p2)
}
   0x9   :  { %s2346_s24 = scalar_lea.vmem %s30_s16, 512  ;;  %p2351_p4 = scmp.lt.s32.totalorder %s30_s16, %s30_s16 }
   0xa   :  { %p2347_p3 = scmp.ne.s32.totalorder %s30_s16, %s2346_s24  ;;  %p2352_p5 = scmp.lt.s32.totalorder %s2346_s24, %s2346_s24 }
   0xc   :  { %p2353_p6 = por %p2352_p5, %p2351_p4 }
   0xe   :  { %p2354_p7 = pnand %p2353_p6, %p2347_p3 }
  0x10   :  { %2357 = shalt.err (!%p2354_p7)
}
  0x11   :  { %s2431_s25 = smov 256   ;;  %s2432_s26 = smov 16  }
  0x12   :  { %35 = dma.hbm_to_vmem [thread:$0]  %s2900_s1, 512, %s30_s16, [#allocation6], %s2431_s25, %s2431_s25, %s2432_s26  }
  0x13   :  { %s2433_s29 = smov [#allocation2]   ;;  %s2358_s7 = scalar_lea.hbm %s2899_s0, 256 }
  0x14   :  { %s17_s30 = sshll.u32 %s2433_s29, 4  ;;  %p2359_p8 = scmp.ne.s32.totalorder %s2899_s0, %s2358_s7  ;;  %s18_s30 = int_to_ptr.vmem [resolvable:$true] %s17_s30 }
  0x15   :  { %p2362_p9 = scmp.lt.u32.totalorder %s2358_s7, %s2899_s0 }
  0x17   :  { %p2364_p10 = pnand %p2362_p9, %p2359_p8 }
  0x19   :  { %2367 = shalt.err (!%p2364_p10)
}
  0x1a   :  { %s2368_s12 = scalar_lea.vmem %s18_s30, 256  ;;  %p2373_p12 = scmp.lt.s32.totalorder %s18_s30, %s18_s30 }
  0x1b   :  { %p2369_p11 = scmp.ne.s32.totalorder %s18_s30, %s2368_s12  ;;  %p2374_p13 = scmp.lt.s32.totalorder %s2368_s12, %s2368_s12 }
  0x1d   :  { %p2375_p0 = por %p2374_p13, %p2373_p12 }
  0x1f   :  { %p2376_p1 = pnand %p2375_p0, %p2369_p11 }
  0x21   :  { %2379 = shalt.err (!%p2376_p1)
}
  0x22   :  { %s2434_s1 = smov 128   ;;  %s2435_s13 = smov 8  }
  0x23   :  { %23 = dma.hbm_to_vmem [thread:$0]  %s2899_s0, 256, %s18_s30, [#allocation3], %s2434_s1, %s2434_s1, %s2435_s13  }
  0x24   :  { %s2436_s16 = smov [#allocation7]   ;;  %s2380_s20 = scalar_lea.hbm %s2901_s2, 2048 }
  0x25   :  { %s41_s17 = sshll.u32 %s2436_s16, 4  ;;  %p2381_p2 = scmp.ne.s32.totalorder %s2901_s2, %s2380_s20  ;;  %s42_s17 = int_to_ptr.vmem [resolvable:$true] %s41_s17 }
  0x26   :  { %p2384_p3 = scmp.lt.u32.totalorder %s2380_s20, %s2901_s2 }
  0x28   :  { %p2386_p4 = pnand %p2384_p3, %p2381_p2 }
  0x2a   :  { %2389 = shalt.err (!%p2386_p4)
}
  0x2b   :  { %s2390_s27 = scalar_lea.vmem %s42_s17, 2048  ;;  %p2395_p6 = scmp.lt.s32.totalorder %s42_s17, %s42_s17 }
  0x2c   :  { %p2391_p5 = scmp.ne.s32.totalorder %s42_s17, %s2390_s27  ;;  %p2396_p7 = scmp.lt.s32.totalorder %s2390_s27, %s2390_s27 }
  0x2e   :  { %p2397_p8 = por %p2396_p7, %p2395_p6 }
  0x30   :  { %p2398_p9 = pnand %p2397_p8, %p2391_p5 }
  0x32   :  { %2401 = shalt.err (!%p2398_p9)
}
  0x33   :  { %47 = dma.hbm_to_vmem [thread:$0]  %s2901_s2, 2048, %s42_s17, [#allocation6], %s2431_s25, %s2431_s25, %s2432_s26  }
  0x34   :  { %2424 = dma.done.wait [#allocation3], 256  }
  0x35   :  { %2425 = vsyncadd [#allocation3], 4294967040 }
  0x36   :  { %2426 = dma.done.wait [#allocation6], 2560  }
  0x37   :  { %2427 = vsyncadd [#allocation6], 4294964736  ;;  %v2437_v0 = vmov 0.0   ;;  %v162_v1 = vld [vmem:[#allocation7 + $0x8] sm:$0xff]  ;;  %v164_v2 = vld [vmem:[#allocation7 + $0x18] sm:$0xff]  ;;  %vm77_vm0 = vcmask 130048   ;;  %v67_v33 = vlaneseq }
  0x38   :  { %148 = vmatprep.mubr.f32.mxu0 %v2437_v0  ;;  %245 = vmatprep.mubr.f32.mxu1 %v2437_v0  ;;  %v161_v3 = vld [vmem:[#allocation7] sm:$0xff]  ;;  %v2511_v4 = vpack.c.bf16 %v164_v2, %v162_v1  ;;  %v163_v5 = vld [vmem:[#allocation7 + $0x10] sm:$0xff]  ;;  %v166_v6 = vld [vmem:[#allocation7 + $0x28] sm:$0xff]  ;;  %vm364_vm1 = vcmask 1041409   ;;  %s2439_s26 = smov 96   ;;  %s2440_s29 = smov 64  }
  0x39   :  { %v168_v7 = vld [vmem:[#allocation7 + $0x38] sm:$0xff]  ;;  %v2513_v8 = vpack.c.bf16 %v163_v5, %v161_v3  ;;  %v165_v10 = vld [vmem:[#allocation7 + $0x20] sm:$0xff]  ;;  %v167_v11 = vld [vmem:[#allocation7 + $0x30] sm:$0xff]  ;;  %v68_v34 = vshrl.u32 %v67_v33, 7  ;;  %vm377_vm2 = vcmask 261120   ;;  %vm177_vm3 = vcmask 523264  }
  0x3a   :  { %v2515_v9 = vpack.c.bf16 %v168_v7, %v166_v6  ;;  %v62_v12 = vld [vmem:[#allocation5 + $0x8] sm:$0xff]  ;;  %1941 = vmatprep.subr.bf16.mxu1 %v2511_v4  ;;  %v64_v13 = vld [vmem:[#allocation5 + $0x18] sm:$0xff]  ;;  %v61_v14 = vld [vmem:[#allocation5] sm:$0xff]  ;;  %v2519_v16 = vpack.c.bf16 %v167_v11, %v165_v10  ;;  %vm577_vm4 = vcmask 1042434   ;;  %vm791_vm5 = vcmask 1043459   ;;  %s2441_s30 = smov [#allocation8]  }
  0x3b   :  { %v63_v15 = vld [vmem:[#allocation5 + $0x10] sm:$0xff]  ;;  %1943 = vmatpush1.bf16.msra.mxu1 %v2513_v8  ;;  %v1936_v17 = vpack.c.bf16 %v64_v13, %v62_v12  ;;  %v170_v19 = vld [vmem:[#allocation7 + $0x48] sm:$0xff]  ;;  %v172_v20 = vld [vmem:[#allocation7 + $0x58] sm:$0xff]  ;;  %v69_v37 = vsub.s32 0, %v68_v34  ;;  %v73_v40 = vsub.s32 1, %v68_v34  ;;  %vm1005_vm6 = vcmask 1044484  }
  0x3c   :  { %v1938_v18 = vpack.c.bf16 %v63_v15, %v61_v14  ;;  %1945 = vmatprep.subr.bf16.mxu1 %v2515_v9  ;;  %v2522_v21 = vpack.c.bf16 %v172_v20, %v170_v19  ;;  %v169_v22 = vld [vmem:[#allocation7 + $0x40] sm:$0xff]  ;;  %v171_v23 = vld [vmem:[#allocation7 + $0x50] sm:$0xff]  ;;  %v174_v24 = vld [vmem:[#allocation7 + $0x68] sm:$0xff]  ;;  %vm1218_vm7 = vcmask 1045509   ;;  %vm1432_vm8 = vcmask 1046534   ;;  %s1885_s5 = sshll.u32 %s2441_s30, 4  ;;  %s1886_s5 = int_to_ptr.vmem [resolvable:$true] %s1885_s5 }
  0x3d   :  { %1937 = vmatprep.subr.bf16.mxu0 %v1936_v17  ;;  %v176_v25 = vld [vmem:[#allocation7 + $0x78] sm:$0xff]  ;;  %v59_v26 = vld [vmem:[#allocation2] sm:$0xff]  ;;  %v2525_v27 = vpack.c.bf16 %v171_v23, %v169_v22  ;;  %v173_v29 = vld [vmem:[#allocation7 + $0x60] sm:$0xff]  ;;  %vm1645_vm9 = vcmask 1047559   ;;  %vm1877_vm10 = vcmask 516096   ;;  %vm1875_vm11 = vcmask 523271   ;;  %p2407_p11 = scmp.lt.s32.totalorder %s1886_s5, %s1886_s5 }
  0x3e   :  { %1939 = vmatpush1.bf16.msra.mxu0 %v1938_v18  ;;  %v2529_v28 = vpack.c.bf16 %v176_v25, %v174_v24  ;;  %v175_v30 = vld [vmem:[#allocation7 + $0x70] sm:$0xff]  ;;  %v60_v31 = vld [vmem:[#allocation2 + $0x8] sm:$0xff]  ;;  %s2402_s6 = scalar_lea.vmem %s1886_s5, 32 }
  0x3f   :  { %1947 = vmatpush1.bf16.msra.mxu1 %v2519_v16  ;;  %1957 = vmatprep.subr.bf16.mxu0 %v2511_v4  ;;  %v2535_v32 = vpack.c.bf16 %v175_v30, %v173_v29  ;;  %v65_v38 = vld [vmem:[%s2902_s3] sm:$0x3]  ;;  %s2438_s3 = smov 32   ;;  %p2403_p10 = scmp.ne.s32.totalorder %s1886_s5, %s2402_s6 }
  0x40   :  { %1949 = vmatprep.subr.bf16.mxu1 %v2522_v21  ;;  %v70_v42 = vrot.slane %v65_v38, %v69_v37  ;;  %v74_v44 = vrot.slane %v65_v38, %v73_v40  ;;  %p2408_p12 = scmp.lt.s32.totalorder %s2402_s6, %s2402_s6 }
  0x41   :  { %1895 = vmatmul.mubr.msk.f32.vlgmr.msra.gmra.mrb[0].mxu0 %vm77_vm0, %v59_v26 }
  0x42   :  { %154 = vmatprep.mubr.f32.mxu0 %v2437_v0  ;;  %1959 = vmatpush1.bf16.msra.mxu0 %v2513_v8  ;;  %p2409_p13 = por %p2408_p12, %p2407_p11 }
  0x43   :  { %1951 = vmatpush1.bf16.msra.mxu1 %v2525_v27  ;;  %1961 = vmatprep.subr.bf16.mxu0 %v2515_v9 }
  0x44   :  { %1953 = vmatprep.subr.bf16.mxu1 %v2529_v28  ;;  %p2410_p0 = pnand %p2409_p13, %p2403_p10 }
  0x45   :  { %1896 = vmatmul.mubr.msk.f32.gmra.mrb[2].mxu0 %vm77_vm0, %v60_v31 }
  0x46   :  { %1963 = vmatpush1.bf16.msra.mxu0 %v2519_v16  ;;  %446 = vmatprep.mubr.f32.mxu0 %v2437_v0 }
  0x47   :  { %1955 = vmatpush1.bf16.msra.mxu1 %v2535_v32  ;;  %1965 = vmatprep.subr.bf16.mxu0 %v2522_v21 }
  0x48   :  { %1973 = vmatprep.subr.bf16.mxu1 %v2511_v4 }
  0x4a   :  { %246 = vmatmul.mubr.f32.vlgmr.msra.gmra.mrb[0].mxu1 %v2437_v0  ;;  %1967 = vmatpush1.bf16.msra.mxu0 %v2525_v27 }
  0x4b   :  { %1969 = vmatprep.subr.bf16.mxu0 %v2529_v28  ;;  %1975 = vmatpush1.bf16.msra.mxu1 %v2513_v8 }
  0x4c   :  { %1977 = vmatprep.subr.bf16.mxu1 %v2515_v9  ;;  %659 = vmatprep.mubr.f32.mxu1 %v2437_v0 }
  0x4e   :  { %1971 = vmatpush1.bf16.msra.mxu0 %v2535_v32 }
  0x4f   :  { %1979 = vmatpush1.bf16.msra.mxu1 %v2519_v16  ;;  %1989 = vmatprep.subr.bf16.mxu0 %v2511_v4 }
  0x50   :  { %1981 = vmatprep.subr.bf16.mxu1 %v2522_v21 }
  0x53   :  { %1983 = vmatpush1.bf16.msra.mxu1 %v2525_v27 }
  0x54   :  { %1985 = vmatprep.subr.bf16.mxu1 %v2529_v28 }
  0x57   :  { %1987 = vmatpush1.bf16.msra.mxu1 %v2535_v32 }
  0x58   :  { %2005 = vmatprep.subr.bf16.mxu1 %v2511_v4 }
 0x114   :  { %v150_v35 = vpop.f32.mrb[0].mxu0 }
 0x115   :  { %v152_v36 = vpop.f32.mrb[1].mxu0  ;;  %v2571_v55 = vadd.f32 %v150_v35, %v70_v42 }
 0x116   :  { %v2567_v52 = vadd.f32 %v152_v36, %v74_v44 }
 0x118   :  { %v156_v39 = vpop.f32.mrb[2].mxu0 }
 0x119   :  { %v158_v41 = vpop.f32.mrb[3].mxu0  ;;  %v2562_v43 = vadd.f32 %v156_v39, %v70_v42 }
 0x11a   :  { %v2564_v49 = vadd.f32 %v158_v41, %v74_v44 }
 0x11d   :  { %v247_v45 = vpop.f32.mrb[0].mxu1 }
 0x11e   :  { %v253_v46 = vrot.slane %v247_v45, 1  ;;  %v249_v47 = vpop.f32.mrb[1].mxu1  ;;  %v256_v56 = vadd.f32 %v247_v45, %v2571_v55 }
 0x11f   :  { %v307_v48 = vrot.slane %v249_v47, 1  ;;  %v308_v51 = vrot.slane %v249_v47, 2 }
 0x120   :  { %v257_v50 = vadd.f32 %v253_v46, %v2562_v43  ;;  %v1897_v1 = vmul.f32 -1.442695, %v256_v56 }
 0x121   :  { %v311_v53 = vadd.f32 %v307_v48, %v2567_v52  ;;  %v312_v54 = vadd.f32 %v308_v51, %v2564_v49 }
 0x122   :  { %2080 = vtanh.f32 %v257_v50  ;;  %v1898_v61 = vmul.f32 -1.442695, %v257_v50 }
 0x123   :  { %2082 = vtanh.f32 %v311_v53  ;;  %v1899_v62 = vmul.f32 -1.442695, %v311_v53  ;;  %v1900_v63 = vmul.f32 -1.442695, %v312_v54 }
 0x124   :  { %2084 = vtanh.f32 %v312_v54 }
 0x125   :  { %2086 = vtanh.f32 %v256_v56 }
 0x126   :  { %2088 = vpow2.f32 %v1898_v61 }
 0x127   :  { %2090 = vpow2.f32 %v1899_v62 }
 0x128   :  { %2092 = vpow2.f32 %v1900_v63 }
 0x129   :  { %2094 = vpow2.f32 %v1897_v1 }
 0x12c   :  { %v2081_v57 = vpop.eup %2080 }
 0x12d   :  { %278 = vrot.lane.b32.xlu0 %v2081_v57, %s2438_s3  ;;  %v2083_v58 = vpop.eup %2082 }
 0x12e   :  { %v2085_v59 = vpop.eup %2084 }
 0x12f   :  { %333 = vrot.lane.b32.xlu1 %v2085_v59, %s2438_s3  ;;  %v2087_v60 = vpop.eup %2086 }
 0x130   :  { %v2089_v2 = vpop.eup %2088 }
 0x131   :  { %331 = vrot.lane.b32.xlu0 %v2083_v58, %s2438_s3  ;;  %v265_v3 = vadd.f32 1.0, %v2089_v2  ;;  %v2091_v5 = vpop.eup %2090 }
 0x132   :  { %v2093_v6 = vpop.eup %2092  ;;  %v319_v7 = vadd.f32 1.0, %v2091_v5 }
 0x133   :  { %276 = vrot.lane.b32.xlu1 %v2087_v60, %s2438_s3  ;;  %2096 = vrcp.f32 %v265_v3  ;;  %v320_v10 = vadd.f32 1.0, %v2093_v6  ;;  %v2095_v11 = vpop.eup %2094 }
 0x134   :  { %2098 = vrcp.f32 %v319_v7  ;;  %v264_v12 = vadd.f32 1.0, %v2095_v11 }
 0x135   :  { %2100 = vrcp.f32 %v320_v10 }
 0x136   :  { %2102 = vrcp.f32 %v264_v12 }
 0x13d   :  { %v2097_v13 = vpop.eup %2096 }
 0x13e   :  { %v2099_v17 = vpop.eup %2098  ;;  %v273_v29 = vmul.f32 0.0, %v2097_v13 }
 0x13f   :  { %v2101_v19 = vpop.eup %2100  ;;  %v327_v33 = vmul.f32 0.0, %v2099_v17 }
 0x140   :  { %v2103_v24 = vpop.eup %2102  ;;  %v328_v34 = vmul.f32 0.0, %v2101_v19 }
 0x141   :  { %v272_v39 = vmul.f32 0.0, %v2103_v24 }
 0x19f   :  { %v279_v14 = vpop.permute.xlu0 %278 }
 0x1a0   :  { %v283_v15 = vmul.f32 %v2097_v13, %v279_v14 }
 0x1a1   :  { %v334_v20 = vpop.permute.xlu1 %333 }
 0x1a2   :  { %288 = vrot.lane.b32.xlu0 %v283_v15, %s2438_s3  ;;  %v338_v23 = vmul.f32 %v2101_v19, %v334_v20 }
 0x1a3   :  { %v332_v18 = vpop.permute.xlu0 %331 }
 0x1a4   :  { %v337_v22 = vmul.f32 %v2099_v17, %v332_v18 }
 0x1a5   :  { %v277_v25 = vpop.permute.xlu1 %276 }
 0x1a6   :  { %341 = vrot.lane.b32.xlu1 %v337_v22, %s2438_s3  ;;  %343 = vrot.lane.b32.xlu0 %v338_v23, %s2438_s3  ;;  %v282_v26 = vmul.f32 %v2103_v24, %v277_v25 }
 0x1aa   :  { %286 = vrot.lane.b32.xlu1 %v282_v26, %s2438_s3 }
 0x214   :  { %v289_v30 = vpop.permute.xlu0 %288 }
 0x215   :  { %v2582_v31 = vadd.f32 %v289_v30, %v273_v29 }
 0x217   :  { %2104 = vtanh.f32 %v2582_v31 }
 0x218   :  { %v342_v35 = vpop.permute.xlu1 %341  ;;  %v344_v36 = vpop.permute.xlu0 %343 }
 0x219   :  { %v2585_v37 = vadd.f32 %v342_v35, %v327_v33  ;;  %v2587_v38 = vadd.f32 %v344_v36, %v328_v34 }
 0x21b   :  { %2106 = vtanh.f32 %v2585_v37 }
 0x21c   :  { %2108 = vtanh.f32 %v2587_v38  ;;  %v287_v40 = vpop.permute.xlu1 %286 }
 0x21d   :  { %v2591_v41 = vadd.f32 %v287_v40, %v272_v39 }
 0x21f   :  { %2110 = vtanh.f32 %v2591_v41 }
 0x221   :  { %v2105_v42 = vpop.eup %2104 }
 0x222   :  { %300 = vrot.lane.b32.xlu0 %v2105_v42, %s2438_s3 }
 0x225   :  { %v2107_v44 = vpop.eup %2106 }
 0x226   :  { %v2109_v45 = vpop.eup %2108  ;;  %353 = vrot.lane.b32.xlu1 %v2107_v44, %s2438_s3 }
 0x227   :  { %355 = vrot.lane.b32.xlu0 %v2109_v45, %s2438_s3 }
 0x229   :  { %v2111_v46 = vpop.eup %2110 }
 0x22a   :  { %298 = vrot.lane.b32.xlu1 %v2111_v46, %s2438_s3 }
 0x294   :  { %v301_v47 = vpop.permute.xlu0 %300 }
 0x295   :  { %v305_v53 = vmul.f32 %v2097_v13, %v301_v47 }
 0x297   :  { %v363_v59 = vrot.slane %v305_v53, 7 }
 0x298   :  { %v354_v48 = vpop.permute.xlu1 %353 }
 0x299   :  { %v356_v50 = vpop.permute.xlu0 %355  ;;  %v359_v51 = vmul.f32 %v2099_v17, %v354_v48 }
 0x29a   :  { %v360_v54 = vmul.f32 %v2101_v19, %v356_v50 }
 0x29b   :  { %v371_v56 = vrot.slane %v359_v51, 7 }
 0x29c   :  { %v372_v57 = vrot.slane %v360_v54, 6  ;;  %v299_v58 = vpop.permute.xlu1 %298 }
 0x29d   :  { %v304_v60 = vmul.f32 %v2103_v24, %v299_v58 }
 0x29e   :  { %v373_v61 = vsel %vm364_vm1, %v372_v57, %v371_v56  ;;  %v476_v56 = vrot.slane %v2582_v31, 7 }
 0x29f   :  { %374 = vrot.lane.b32.xlu1 %v373_v61, %s2439_s26  ;;  %v365_v62 = vsel %vm364_vm1, %v363_v59, %v304_v60  ;;  %v536_v60 = vrot.slane %v2585_v37, 1  ;;  %v537_v61 = vrot.slane %v2587_v38, 1 }
 0x2a0   :  { %366 = vrot.lane.b32.xlu0 %v365_v62, %s2440_s29 }
 0x311   :  { %v375_v63 = vpop.permute.xlu1 %374 }
 0x312   :  { %v367_v1 = vpop.permute.xlu0 %366 }
 0x313   :  { %v378_v2 = vsel %vm377_vm2, %v367_v1, %v375_v63 }
 0x314   :  { %1901 = vmatmul.mubr.msk.f32.vlgmr.msra.gmra.mrb[4].mxu0 %vm177_vm3, %v378_v2  ;;  %v475_v2 = vrot.slane %v2591_v41, 7 }
 0x315   :  { %1991 = vmatpush1.bf16.msra.mxu0 %v2513_v8  ;;  %873 = vmatprep.mubr.f32.mxu0 %v2437_v0 }
 0x316   :  { %1993 = vmatprep.subr.bf16.mxu0 %v2515_v9 }
 0x319   :  { %1995 = vmatpush1.bf16.msra.mxu0 %v2519_v16 }
 0x31a   :  { %1997 = vmatprep.subr.bf16.mxu0 %v2522_v21 }
 0x31d   :  { %1999 = vmatpush1.bf16.msra.mxu0 %v2525_v27 }
 0x31e   :  { %2001 = vmatprep.subr.bf16.mxu0 %v2529_v28 }
 0x321   :  { %2003 = vmatpush1.bf16.msra.mxu0 %v2535_v32 }
 0x322   :  { %2021 = vmatprep.subr.bf16.mxu0 %v2511_v4 }
 0x3e7   :  { %v448_v3 = vpop.f32.mrb[4].mxu0 }
 0x3e8   :  { %v458_v5 = vadd.f32 %v448_v3, %v2562_v43  ;;  %v450_v6 = vpop.f32.mrb[5].mxu0  ;;  %v454_v11 = vrot.slane %v448_v3, 7 }
 0x3e9   :  { %v514_v7 = vrot.slane %v450_v6, 2  ;;  %v515_v10 = vrot.slane %v450_v6, 3 }
 0x3ea   :  { %2112 = vtanh.f32 %v458_v5  ;;  %v457_v14 = vadd.f32 %v454_v11, %v2571_v55  ;;  %v1903_v20 = vmul.f32 -1.442695, %v458_v5 }
 0x3eb   :  { %v518_v12 = vadd.f32 %v514_v7, %v2567_v52  ;;  %v519_v13 = vadd.f32 %v515_v10, %v2564_v49 }
 0x3ec   :  { %v1902_v24 = vmul.f32 -1.442695, %v457_v14 }
 0x3ed   :  { %2114 = vtanh.f32 %v518_v12  ;;  %v1904_v22 = vmul.f32 -1.442695, %v518_v12  ;;  %v1905_v23 = vmul.f32 -1.442695, %v519_v13 }
 0x3ee   :  { %2116 = vtanh.f32 %v519_v13 }
 0x3ef   :  { %2118 = vtanh.f32 %v457_v14 }
 0x3f0   :  { %2120 = vpow2.f32 %v1903_v20 }
 0x3f1   :  { %2122 = vpow2.f32 %v1904_v22 }
 0x3f2   :  { %2124 = vpow2.f32 %v1905_v23 }
 0x3f3   :  { %2126 = vpow2.f32 %v1902_v24 }
 0x3f4   :  { %v2113_v15 = vpop.eup %2112 }
 0x3f5   :  { %485 = vrot.lane.b32.xlu0 %v2113_v15, %s2438_s3 }
 0x3f7   :  { %v2115_v17 = vpop.eup %2114 }
 0x3f8   :  { %v2117_v18 = vpop.eup %2116  ;;  %544 = vrot.lane.b32.xlu1 %v2115_v17, %s2438_s3 }
 0x3f9   :  { %546 = vrot.lane.b32.xlu0 %v2117_v18, %s2438_s3  ;;  %v2119_v19 = vpop.eup %2118 }
 0x3fa   :  { %v2121_v25 = vpop.eup %2120 }
 0x3fb   :  { %v466_v26 = vadd.f32 1.0, %v2121_v25  ;;  %v2123_v29 = vpop.eup %2122 }
 0x3fc   :  { %483 = vrot.lane.b32.xlu1 %v2119_v19, %s2438_s3  ;;  %v2125_v30 = vpop.eup %2124  ;;  %v526_v33 = vadd.f32 1.0, %v2123_v29 }
 0x3fd   :  { %2128 = vrcp.f32 %v466_v26  ;;  %v2127_v34 = vpop.eup %2126  ;;  %v527_v35 = vadd.f32 1.0, %v2125_v30 }
 0x3fe   :  { %v465_v36 = vadd.f32 1.0, %v2127_v34  ;;  %2130 = vrcp.f32 %v526_v33 }
 0x3ff   :  { %2132 = vrcp.f32 %v527_v35 }
 0x400   :  { %2134 = vrcp.f32 %v465_v36 }
 0x407   :  { %v2129_v39 = vpop.eup %2128 }
 0x408   :  { %v2131_v44 = vpop.eup %2130  ;;  %v480_v57 = vmul.f32 %v2129_v39, %v476_v56 }
 0x409   :  { %v2133_v46 = vpop.eup %2132  ;;  %v540_v62 = vmul.f32 %v2131_v44, %v536_v60 }
 0x40a   :  { %v2135_v51 = vpop.eup %2134  ;;  %v541_v1 = vmul.f32 %v2133_v46, %v537_v61 }
 0x40b   :  { %v479_v31 = vmul.f32 %v2135_v51, %v475_v2 }
 0x467   :  { %v486_v40 = vpop.permute.xlu0 %485 }
 0x468   :  { %v490_v42 = vmul.f32 %v2129_v39, %v486_v40 }
 0x46a   :  { %495 = vrot.lane.b32.xlu0 %v490_v42, %s2438_s3  ;;  %v545_v45 = vpop.permute.xlu1 %544 }
 0x46b   :  { %v550_v47 = vmul.f32 %v2131_v44, %v545_v45  ;;  %v547_v48 = vpop.permute.xlu0 %546 }
 0x46c   :  { %v551_v50 = vmul.f32 %v2133_v46, %v547_v48 }
 0x46d   :  { %554 = vrot.lane.b32.xlu1 %v550_v47, %s2438_s3 }
 0x46e   :  { %556 = vrot.lane.b32.xlu0 %v551_v50, %s2438_s3  ;;  %v484_v53 = vpop.permute.xlu1 %483 }
 0x46f   :  { %v489_v54 = vmul.f32 %v2135_v51, %v484_v53 }
 0x471   :  { %493 = vrot.lane.b32.xlu1 %v489_v54, %s2438_s3 }
 0x4dc   :  { %v496_v58 = vpop.permute.xlu0 %495 }
 0x4dd   :  { %v2624_v59 = vadd.f32 %v496_v58, %v480_v57 }
 0x4df   :  { %2136 = vtanh.f32 %v2624_v59  ;;  %v555_v63 = vpop.permute.xlu1 %554 }
 0x4e0   :  { %v2630_v3 = vadd.f32 %v555_v63, %v540_v62  ;;  %v557_v5 = vpop.permute.xlu0 %556 }
 0x4e1   :  { %v2632_v6 = vadd.f32 %v557_v5, %v541_v1 }
 0x4e2   :  { %2138 = vtanh.f32 %v2630_v3 }
 0x4e3   :  { %2140 = vtanh.f32 %v2632_v6  ;;  %v494_v7 = vpop.permute.xlu1 %493 }
 0x4e4   :  { %v2636_v10 = vadd.f32 %v494_v7, %v479_v31 }
 0x4e6   :  { %2142 = vtanh.f32 %v2636_v10 }
 0x4e9   :  { %v2137_v37 = vpop.eup %2136 }
 0x4ea   :  { %507 = vrot.lane.b32.xlu0 %v2137_v37, %s2438_s3 }
 0x4ec   :  { %v2139_v38 = vpop.eup %2138 }
 0x4ed   :  { %v2141_v41 = vpop.eup %2140  ;;  %566 = vrot.lane.b32.xlu1 %v2139_v38, %s2438_s3 }
 0x4ee   :  { %568 = vrot.lane.b32.xlu0 %v2141_v41, %s2438_s3 }
 0x4f0   :  { %v2143_v11 = vpop.eup %2142 }
 0x4f1   :  { %505 = vrot.lane.b32.xlu1 %v2143_v11, %s2438_s3 }
 0x55c   :  { %v508_v12 = vpop.permute.xlu0 %507 }
 0x55d   :  { %v512_v14 = vmul.f32 %v2129_v39, %v508_v12 }
 0x55f   :  { %v567_v13 = vpop.permute.xlu1 %566  ;;  %v576_v23 = vrot.slane %v512_v14, 7 }
 0x560   :  { %v572_v15 = vmul.f32 %v2131_v44, %v567_v13  ;;  %v569_v17 = vpop.permute.xlu0 %568 }
 0x561   :  { %v573_v18 = vmul.f32 %v2133_v46, %v569_v17 }
 0x562   :  { %v584_v19 = vrot.slane %v572_v15, 5 }
 0x563   :  { %v585_v20 = vrot.slane %v573_v18, 4  ;;  %v506_v22 = vpop.permute.xlu1 %505 }
 0x564   :  { %v511_v24 = vmul.f32 %v2135_v51, %v506_v22  ;;  %v690_v22 = vrot.slane %v2624_v59, 7 }
 0x565   :  { %v586_v25 = vsel %vm577_vm4, %v585_v20, %v584_v19 }
 0x566   :  { %587 = vrot.lane.b32.xlu1 %v586_v25, %s2439_s26  ;;  %v578_v26 = vsel %vm577_vm4, %v576_v23, %v511_v24 }
 0x567   :  { %579 = vrot.lane.b32.xlu0 %v578_v26, %s2440_s29  ;;  %v750_v26 = vrot.slane %v2630_v3, 1 }
 0x5d8   :  { %v588_v29 = vpop.permute.xlu1 %587 }
 0x5d9   :  { %v580_v30 = vpop.permute.xlu0 %579 }
 0x5da   :  { %v590_v33 = vsel %vm377_vm2, %v580_v30, %v588_v29  ;;  %v751_v29 = vrot.slane %v2632_v6, 1 }
 0x5db   :  { %v592_v34 = vrot.slane %v590_v33, 1 }
 0x5dd   :  { %1906 = vmatmul.mubr.msk.f32.vlgmr.msra.gmra.mrb[2].mxu1 %vm177_vm3, %v592_v34 }
 0x5de   :  { %2007 = vmatpush1.bf16.msra.mxu1 %v2513_v8  ;;  %1086 = vmatprep.mubr.f32.mxu1 %v2437_v0 }
 0x5df   :  { %2009 = vmatprep.subr.bf16.mxu1 %v2515_v9 }
 0x5e2   :  { %2011 = vmatpush1.bf16.msra.mxu1 %v2519_v16 }
 0x5e3   :  { %2013 = vmatprep.subr.bf16.mxu1 %v2522_v21 }
 0x5e6   :  { %2015 = vmatpush1.bf16.msra.mxu1 %v2525_v27 }
 0x5e7   :  { %2017 = vmatprep.subr.bf16.mxu1 %v2529_v28 }
 0x5ea   :  { %2019 = vmatpush1.bf16.msra.mxu1 %v2535_v32 }
 0x5eb   :  { %2037 = vmatprep.subr.bf16.mxu1 %v2511_v4 }
 0x6b0   :  { %v661_v35 = vpop.f32.mrb[2].mxu1 }
 0x6b1   :  { %v668_v36 = vrot.slane %v661_v35, 7  ;;  %v663_v39 = vpop.f32.mrb[3].mxu1  ;;  %v667_v45 = vrot.slane %v661_v35, 6  ;;  %v689_v35 = vrot.slane %v2636_v10, 7 }
 0x6b2   :  { %v728_v42 = vrot.slane %v663_v39, 3  ;;  %v729_v44 = vrot.slane %v663_v39, 4 }
 0x6b3   :  { %v672_v40 = vadd.f32 %v668_v36, %v2562_v43  ;;  %v671_v48 = vadd.f32 %v667_v45, %v2571_v55 }
 0x6b4   :  { %v732_v46 = vadd.f32 %v728_v42, %v2567_v52  ;;  %v733_v47 = vadd.f32 %v729_v44, %v2564_v49 }
 0x6b5   :  { %2144 = vtanh.f32 %v672_v40  ;;  %v1908_v56 = vmul.f32 -1.442695, %v672_v40  ;;  %v1907_v60 = vmul.f32 -1.442695, %v671_v48 }
 0x6b6   :  { %2146 = vtanh.f32 %v732_v46  ;;  %v1909_v57 = vmul.f32 -1.442695, %v732_v46  ;;  %v1910_v58 = vmul.f32 -1.442695, %v733_v47 }
 0x6b7   :  { %2148 = vtanh.f32 %v733_v47 }
 0x6b8   :  { %2150 = vtanh.f32 %v671_v48 }
 0x6b9   :  { %2152 = vpow2.f32 %v1908_v56 }
 0x6ba   :  { %2154 = vpow2.f32 %v1909_v57 }
 0x6bb   :  { %2156 = vpow2.f32 %v1910_v58 }
 0x6bc   :  { %2158 = vpow2.f32 %v1907_v60 }
 0x6bf   :  { %v2145_v50 = vpop.eup %2144 }
 0x6c0   :  { %699 = vrot.lane.b32.xlu0 %v2145_v50, %s2438_s3  ;;  %v2147_v51 = vpop.eup %2146 }
 0x6c1   :  { %v2149_v53 = vpop.eup %2148  ;;  %758 = vrot.lane.b32.xlu1 %v2147_v51, %s2438_s3 }
 0x6c2   :  { %v2151_v54 = vpop.eup %2150 }
 0x6c3   :  { %v2153_v61 = vpop.eup %2152 }
 0x6c4   :  { %760 = vrot.lane.b32.xlu0 %v2149_v53, %s2438_s3  ;;  %v680_v62 = vadd.f32 1.0, %v2153_v61  ;;  %v2155_v63 = vpop.eup %2154 }
 0x6c5   :  { %697 = vrot.lane.b32.xlu1 %v2151_v54, %s2438_s3  ;;  %v2157_v1 = vpop.eup %2156  ;;  %v740_v2 = vadd.f32 1.0, %v2155_v63 }
 0x6c6   :  { %2160 = vrcp.f32 %v680_v62  ;;  %v2159_v5 = vpop.eup %2158  ;;  %v741_v31 = vadd.f32 1.0, %v2157_v1 }
 0x6c7   :  { %v679_v7 = vadd.f32 1.0, %v2159_v5  ;;  %2162 = vrcp.f32 %v740_v2 }
 0x6c8   :  { %2164 = vrcp.f32 %v741_v31 }
 0x6c9   :  { %2166 = vrcp.f32 %v679_v7 }
 0x6d0   :  { %v2161_v37 = vpop.eup %2160 }
 0x6d1   :  { %v2163_v11 = vpop.eup %2162  ;;  %v694_v23 = vmul.f32 %v2161_v37, %v690_v22 }
 0x6d2   :  { %v2165_v13 = vpop.eup %2164  ;;  %v754_v30 = vmul.f32 %v2163_v11, %v750_v26 }
 0x6d3   :  { %v2167_v18 = vpop.eup %2166  ;;  %v755_v34 = vmul.f32 %v2165_v13, %v751_v29 }
 0x6d4   :  { %v693_v59 = vmul.f32 %v2167_v18, %v689_v35 }
 0x732   :  { %v700_v38 = vpop.permute.xlu0 %699 }
 0x733   :  { %v704_v41 = vmul.f32 %v2161_v37, %v700_v38  ;;  %v759_v12 = vpop.permute.xlu1 %758 }
 0x734   :  { %v764_v14 = vmul.f32 %v2163_v11, %v759_v12 }
 0x735   :  { %709 = vrot.lane.b32.xlu0 %v704_v41, %s2438_s3 }
 0x736   :  { %v761_v15 = vpop.permute.xlu0 %760  ;;  %768 = vrot.lane.b32.xlu1 %v764_v14, %s2438_s3 }
 0x737   :  { %v765_v17 = vmul.f32 %v2165_v13, %v761_v15  ;;  %v698_v19 = vpop.permute.xlu1 %697 }
 0x738   :  { %v703_v20 = vmul.f32 %v2167_v18, %v698_v19 }
 0x739   :  { %770 = vrot.lane.b32.xlu0 %v765_v17, %s2438_s3 }
 0x73a   :  { %707 = vrot.lane.b32.xlu1 %v703_v20, %s2438_s3 }
 0x7a7   :  { %v710_v24 = vpop.permute.xlu0 %709 }
 0x7a8   :  { %v2669_v25 = vadd.f32 %v710_v24, %v694_v23  ;;  %v769_v33 = vpop.permute.xlu1 %768 }
 0x7a9   :  { %v2675_v36 = vadd.f32 %v769_v33, %v754_v30 }
 0x7aa   :  { %2168 = vtanh.f32 %v2669_v25 }
 0x7ab   :  { %v771_v39 = vpop.permute.xlu0 %770  ;;  %2170 = vtanh.f32 %v2675_v36 }
 0x7ac   :  { %v2677_v40 = vadd.f32 %v771_v39, %v755_v34  ;;  %v708_v3 = vpop.permute.xlu1 %707 }
 0x7ad   :  { %v2681_v42 = vadd.f32 %v708_v3, %v693_v59 }
 0x7ae   :  { %2172 = vtanh.f32 %v2677_v40 }
 0x7af   :  { %2174 = vtanh.f32 %v2681_v42 }
 0x7b4   :  { %v2169_v6 = vpop.eup %2168 }
 0x7b5   :  { %721 = vrot.lane.b32.xlu0 %v2169_v6, %s2438_s3  ;;  %v2171_v44 = vpop.eup %2170 }
 0x7b6   :  { %780 = vrot.lane.b32.xlu1 %v2171_v44, %s2438_s3 }
 0x7b8   :  { %v2173_v10 = vpop.eup %2172 }
 0x7b9   :  { %782 = vrot.lane.b32.xlu0 %v2173_v10, %s2438_s3  ;;  %v2175_v45 = vpop.eup %2174 }
 0x7ba   :  { %719 = vrot.lane.b32.xlu1 %v2175_v45, %s2438_s3 }
 0x827   :  { %v722_v46 = vpop.permute.xlu0 %721 }
 0x828   :  { %v781_v47 = vpop.permute.xlu1 %780  ;;  %v726_v48 = vmul.f32 %v2161_v37, %v722_v46 }
 0x829   :  { %v786_v50 = vmul.f32 %v2163_v11, %v781_v47 }
 0x82a   :  { %v790_v58 = vrot.slane %v726_v48, 7 }
 0x82b   :  { %v783_v51 = vpop.permute.xlu0 %782  ;;  %v798_v54 = vrot.slane %v786_v50, 3 }
 0x82c   :  { %v787_v53 = vmul.f32 %v2165_v13, %v783_v51  ;;  %v720_v57 = vpop.permute.xlu1 %719 }
 0x82d   :  { %v725_v60 = vmul.f32 %v2167_v18, %v720_v57 }
 0x82e   :  { %v799_v56 = vrot.slane %v787_v53, 2 }
 0x82f   :  { %v792_v62 = vsel %vm791_vm5, %v790_v58, %v725_v60  ;;  %v903_v60 = vrot.slane %v2681_v42, 7 }
 0x830   :  { %v800_v61 = vsel %vm791_vm5, %v799_v56, %v798_v54  ;;  %793 = vrot.lane.b32.xlu0 %v792_v62, %s2440_s29  ;;  %v904_v56 = vrot.slane %v2669_v25, 7  ;;  %v964_v62 = vrot.slane %v2675_v36, 1 }
 0x831   :  { %801 = vrot.lane.b32.xlu1 %v800_v61, %s2439_s26 }
 0x8a2   :  { %v794_v1 = vpop.permute.xlu0 %793 }
 0x8a3   :  { %v802_v63 = vpop.permute.xlu1 %801 }
 0x8a4   :  { %v804_v2 = vsel %vm377_vm2, %v794_v1, %v802_v63 }
 0x8a5   :  { %v806_v5 = vrot.slane %v804_v2, 2 }
 0x8a7   :  { %1911 = vmatmul.mubr.msk.f32.vlgmr.msra.gmra.mrb[6].mxu0 %vm177_vm3, %v806_v5 }
 0x8a8   :  { %2023 = vmatpush1.bf16.msra.mxu0 %v2513_v8  ;;  %1300 = vmatprep.mubr.f32.mxu0 %v2437_v0 }
 0x8a9   :  { %2025 = vmatprep.subr.bf16.mxu0 %v2515_v9 }
 0x8ac   :  { %2027 = vmatpush1.bf16.msra.mxu0 %v2519_v16 }
 0x8ad   :  { %2029 = vmatprep.subr.bf16.mxu0 %v2522_v21 }
 0x8b0   :  { %2031 = vmatpush1.bf16.msra.mxu0 %v2525_v27 }
 0x8b1   :  { %2033 = vmatprep.subr.bf16.mxu0 %v2529_v28 }
 0x8b4   :  { %2035 = vmatpush1.bf16.msra.mxu0 %v2535_v32 }
 0x8b5   :  { %2053 = vmatprep.subr.bf16.mxu0 %v2511_v4 }
 0x97a   :  { %v875_v31 = vpop.f32.mrb[6].mxu0 }
 0x97b   :  { %v882_v7 = vrot.slane %v875_v31, 6  ;;  %v877_v37 = vpop.f32.mrb[7].mxu0  ;;  %v881_v38 = vrot.slane %v875_v31, 5 }
 0x97c   :  { %v942_v11 = vrot.slane %v877_v37, 4  ;;  %v943_v13 = vrot.slane %v877_v37, 5 }
 0x97d   :  { %v886_v41 = vadd.f32 %v882_v7, %v2562_v43  ;;  %v885_v12 = vadd.f32 %v881_v38, %v2571_v55  ;;  %v965_v7 = vrot.slane %v2677_v40, 1 }
 0x97e   :  { %v946_v14 = vadd.f32 %v942_v11, %v2567_v52  ;;  %v947_v15 = vadd.f32 %v943_v13, %v2564_v49 }
 0x97f   :  { %2176 = vtanh.f32 %v886_v41  ;;  %v1913_v20 = vmul.f32 -1.442695, %v886_v41  ;;  %v1912_v22 = vmul.f32 -1.442695, %v885_v12 }
 0x980   :  { %2178 = vtanh.f32 %v885_v12  ;;  %v1914_v23 = vmul.f32 -1.442695, %v946_v14  ;;  %v1915_v24 = vmul.f32 -1.442695, %v947_v15 }
 0x981   :  { %2180 = vtanh.f32 %v946_v14 }
 0x982   :  { %2182 = vtanh.f32 %v947_v15 }
 0x983   :  { %2184 = vpow2.f32 %v1913_v20 }
 0x984   :  { %2186 = vpow2.f32 %v1912_v22 }
 0x985   :  { %2188 = vpow2.f32 %v1914_v23 }
 0x986   :  { %2190 = vpow2.f32 %v1915_v24 }
 0x989   :  { %v2177_v17 = vpop.eup %2176 }
 0x98a   :  { %913 = vrot.lane.b32.xlu0 %v2177_v17, %s2438_s3  ;;  %v2179_v4 = vpop.eup %2178 }
 0x98b   :  { %v2181_v18 = vpop.eup %2180 }
 0x98c   :  { %972 = vrot.lane.b32.xlu1 %v2181_v18, %s2438_s3  ;;  %v2183_v19 = vpop.eup %2182 }
 0x98d   :  { %v2185_v26 = vpop.eup %2184 }
 0x98e   :  { %911 = vrot.lane.b32.xlu0 %v2179_v4, %s2438_s3  ;;  %v894_v29 = vadd.f32 1.0, %v2185_v26  ;;  %v2187_v30 = vpop.eup %2186 }
 0x98f   :  { %v2189_v33 = vpop.eup %2188  ;;  %v893_v34 = vadd.f32 1.0, %v2187_v30 }
 0x990   :  { %974 = vrot.lane.b32.xlu1 %v2183_v19, %s2438_s3  ;;  %2192 = vrcp.f32 %v894_v29  ;;  %v954_v35 = vadd.f32 1.0, %v2189_v33  ;;  %v2191_v39 = vpop.eup %2190 }
 0x991   :  { %2194 = vrcp.f32 %v893_v34  ;;  %v955_v59 = vadd.f32 1.0, %v2191_v39 }
 0x992   :  { %2196 = vrcp.f32 %v954_v35 }
 0x993   :  { %2198 = vrcp.f32 %v955_v59 }
 0x99a   :  { %v2193_v3 = vpop.eup %2192 }
 0x99b   :  { %v2195_v10 = vpop.eup %2194  ;;  %v908_v57 = vmul.f32 %v2193_v3, %v904_v56 }
 0x99c   :  { %v2197_v46 = vpop.eup %2196  ;;  %v907_v63 = vmul.f32 %v2195_v10, %v903_v60 }
 0x99d   :  { %v2199_v51 = vpop.eup %2198  ;;  %v968_v1 = vmul.f32 %v2197_v46, %v964_v62 }
 0x99e   :  { %v969_v25 = vmul.f32 %v2199_v51, %v965_v7 }
 0x9fc   :  { %v914_v6 = vpop.permute.xlu0 %913 }
 0x9fd   :  { %v918_v44 = vmul.f32 %v2193_v3, %v914_v6 }
 0x9fe   :  { %v973_v47 = vpop.permute.xlu1 %972 }
 0x9ff   :  { %923 = vrot.lane.b32.xlu0 %v918_v44, %s2438_s3  ;;  %v978_v50 = vmul.f32 %v2197_v46, %v973_v47 }
 0xa00   :  { %v912_v45 = vpop.permute.xlu0 %911 }
 0xa01   :  { %v917_v48 = vmul.f32 %v2195_v10, %v912_v45  ;;  %982 = vrot.lane.b32.xlu1 %v978_v50, %s2438_s3 }
 0xa02   :  { %v975_v53 = vpop.permute.xlu1 %974 }
 0xa03   :  { %921 = vrot.lane.b32.xlu0 %v917_v48, %s2438_s3  ;;  %v979_v54 = vmul.f32 %v2199_v51, %v975_v53 }
 0xa05   :  { %984 = vrot.lane.b32.xlu1 %v979_v54, %s2438_s3 }
 0xa71   :  { %v924_v58 = vpop.permute.xlu0 %923 }
 0xa72   :  { %v2715_v61 = vadd.f32 %v924_v58, %v908_v57 }
 0xa73   :  { %v983_v5 = vpop.permute.xlu1 %982 }
 0xa74   :  { %2200 = vtanh.f32 %v2715_v61  ;;  %v2722_v37 = vadd.f32 %v983_v5, %v968_v1 }
 0xa75   :  { %v922_v2 = vpop.permute.xlu0 %921 }
 0xa76   :  { %v2719_v31 = vadd.f32 %v922_v2, %v907_v63 }
 0xa77   :  { %v985_v42 = vpop.permute.xlu1 %984 }
 0xa78   :  { %2202 = vtanh.f32 %v2719_v31  ;;  %v2726_v38 = vadd.f32 %v985_v42, %v969_v25 }
 0xa79   :  { %2204 = vtanh.f32 %v2722_v37 }
 0xa7a   :  { %2206 = vtanh.f32 %v2726_v38 }
 0xa7e   :  { %v2201_v36 = vpop.eup %2200 }
 0xa7f   :  { %935 = vrot.lane.b32.xlu0 %v2201_v36, %s2438_s3 }
 0xa82   :  { %v2203_v41 = vpop.eup %2202 }
 0xa83   :  { %v2205_v11 = vpop.eup %2204  ;;  %933 = vrot.lane.b32.xlu0 %v2203_v41, %s2438_s3 }
 0xa84   :  { %994 = vrot.lane.b32.xlu1 %v2205_v11, %s2438_s3  ;;  %v2207_v40 = vpop.eup %2206 }
 0xa88   :  { %996 = vrot.lane.b32.xlu1 %v2207_v40, %s2438_s3 }
 0xaf1   :  { %v936_v12 = vpop.permute.xlu0 %935 }
 0xaf2   :  { %v940_v13 = vmul.f32 %v2193_v3, %v936_v12 }
 0xaf4   :  { %v1004_v15 = vrot.slane %v940_v13, 7 }
 0xaf5   :  { %v934_v14 = vpop.permute.xlu0 %933 }
 0xaf6   :  { %v995_v17 = vpop.permute.xlu1 %994  ;;  %v939_v4 = vmul.f32 %v2195_v10, %v934_v14 }
 0xaf7   :  { %v1000_v18 = vmul.f32 %v2197_v46, %v995_v17 }
 0xaf8   :  { %v1006_v19 = vsel %vm1005_vm6, %v1004_v15, %v939_v4 }
 0xaf9   :  { %1007 = vrot.lane.b32.xlu0 %v1006_v19, %s2440_s29  ;;  %v1012_v22 = vrot.slane %v1000_v18, 1  ;;  %v1117_v18 = vrot.slane %v2715_v61, 7 }
 0xafa   :  { %v997_v20 = vpop.permute.xlu1 %996 }
 0xafb   :  { %v1001_v23 = vmul.f32 %v2199_v51, %v997_v20 }
 0xafd   :  { %v1013_v24 = vsel %vm1005_vm6, %v1001_v23, %v1012_v22  ;;  %v1177_v23 = vrot.slane %v2722_v37, 1 }
 0xafe   :  { %1014 = vrot.lane.b32.xlu1 %v1013_v24, %s2439_s26  ;;  %v1178_v24 = vrot.slane %v2726_v38, 1 }
 0xb6b   :  { %v1008_v26 = vpop.permute.xlu0 %1007 }
 0xb70   :  { %v1015_v29 = vpop.permute.xlu1 %1014 }
 0xb71   :  { %v1017_v30 = vsel %vm377_vm2, %v1008_v26, %v1015_v29 }
 0xb72   :  { %v1019_v33 = vrot.slane %v1017_v30, 3 }
 0xb74   :  { %1916 = vmatmul.mubr.msk.f32.vlgmr.msra.gmra.mrb[4].mxu1 %vm177_vm3, %v1019_v33  ;;  %v1116_v33 = vrot.slane %v2719_v31, 7 }
 0xb75   :  { %2039 = vmatpush1.bf16.msra.mxu1 %v2513_v8  ;;  %1514 = vmatprep.mubr.f32.mxu1 %v2437_v0 }
 0xb76   :  { %2041 = vmatprep.subr.bf16.mxu1 %v2515_v9 }
 0xb79   :  { %2043 = vmatpush1.bf16.msra.mxu1 %v2519_v16 }
 0xb7a   :  { %2045 = vmatprep.subr.bf16.mxu1 %v2522_v21 }
 0xb7d   :  { %2047 = vmatpush1.bf16.msra.mxu1 %v2525_v27 }
 0xb7e   :  { %2049 = vmatprep.subr.bf16.mxu1 %v2529_v28 }
 0xb81   :  { %2051 = vmatpush1.bf16.msra.mxu1 %v2535_v32 }
 0xc47   :  { %v1088_v34 = vpop.f32.mrb[4].mxu1 }
 0xc48   :  { %v1095_v35 = vrot.slane %v1088_v34, 5  ;;  %v1090_v39 = vpop.f32.mrb[5].mxu1  ;;  %v1094_v44 = vrot.slane %v1088_v34, 4 }
 0xc49   :  { %v1155_v3 = vrot.slane %v1090_v39, 5  ;;  %v1156_v6 = vrot.slane %v1090_v39, 6 }
 0xc4a   :  { %v1099_v59 = vadd.f32 %v1095_v35, %v2562_v43  ;;  %v1098_v46 = vadd.f32 %v1094_v44, %v2571_v55 }
 0xc4b   :  { %v1159_v10 = vadd.f32 %v1155_v3, %v2567_v52  ;;  %v1160_v45 = vadd.f32 %v1156_v6, %v2564_v49 }
 0xc4c   :  { %2208 = vtanh.f32 %v1099_v59  ;;  %v1918_v53 = vmul.f32 -1.442695, %v1099_v59  ;;  %v1917_v57 = vmul.f32 -1.442695, %v1098_v46 }
 0xc4d   :  { %2210 = vtanh.f32 %v1159_v10  ;;  %v1919_v54 = vmul.f32 -1.442695, %v1159_v10  ;;  %v1920_v56 = vmul.f32 -1.442695, %v1160_v45 }
 0xc4e   :  { %2212 = vtanh.f32 %v1160_v45 }
 0xc4f   :  { %2214 = vtanh.f32 %v1098_v46 }
 0xc50   :  { %2216 = vpow2.f32 %v1918_v53 }
 0xc51   :  { %2218 = vpow2.f32 %v1919_v54 }
 0xc52   :  { %2220 = vpow2.f32 %v1920_v56 }
 0xc53   :  { %2222 = vpow2.f32 %v1917_v57 }
 0xc56   :  { %v2209_v47 = vpop.eup %2208 }
 0xc57   :  { %1126 = vrot.lane.b32.xlu0 %v2209_v47, %s2438_s3  ;;  %v2211_v48 = vpop.eup %2210 }
 0xc58   :  { %v2213_v50 = vpop.eup %2212  ;;  %1185 = vrot.lane.b32.xlu1 %v2211_v48, %s2438_s3 }
 0xc59   :  { %v2215_v51 = vpop.eup %2214 }
 0xc5a   :  { %v2217_v58 = vpop.eup %2216 }
 0xc5b   :  { %1187 = vrot.lane.b32.xlu0 %v2213_v50, %s2438_s3  ;;  %v1107_v60 = vadd.f32 1.0, %v2217_v58  ;;  %v2219_v62 = vpop.eup %2218 }
 0xc5c   :  { %1124 = vrot.lane.b32.xlu1 %v2215_v51, %s2438_s3  ;;  %v2221_v63 = vpop.eup %2220  ;;  %v1167_v1 = vadd.f32 1.0, %v2219_v62 }
 0xc5d   :  { %2224 = vrcp.f32 %v1107_v60  ;;  %v2223_v2 = vpop.eup %2222  ;;  %v1168_v5 = vadd.f32 1.0, %v2221_v63 }
 0xc5e   :  { %v1106_v7 = vadd.f32 1.0, %v2223_v2  ;;  %2226 = vrcp.f32 %v1167_v1 }
 0xc5f   :  { %2228 = vrcp.f32 %v1168_v5 }
 0xc60   :  { %2230 = vrcp.f32 %v1106_v7 }
 0xc67   :  { %v2225_v25 = vpop.eup %2224 }
 0xc68   :  { %v2227_v41 = vpop.eup %2226  ;;  %v1121_v19 = vmul.f32 %v2225_v25, %v1117_v18 }
 0xc69   :  { %v2229_v40 = vpop.eup %2228  ;;  %v1181_v26 = vmul.f32 %v2227_v41, %v1177_v23 }
 0xc6a   :  { %v2231_v15 = vpop.eup %2230  ;;  %v1182_v30 = vmul.f32 %v2229_v40, %v1178_v24 }
 0xc6b   :  { %v1120_v61 = vmul.f32 %v2231_v15, %v1116_v33 }
 0xcc9   :  { %v1127_v42 = vpop.permute.xlu0 %1126 }
 0xcca   :  { %v1131_v36 = vmul.f32 %v2225_v25, %v1127_v42  ;;  %v1186_v11 = vpop.permute.xlu1 %1185 }
 0xccb   :  { %v1191_v12 = vmul.f32 %v2227_v41, %v1186_v11 }
 0xccc   :  { %1136 = vrot.lane.b32.xlu0 %v1131_v36, %s2438_s3 }
 0xccd   :  { %v1188_v13 = vpop.permute.xlu0 %1187  ;;  %1195 = vrot.lane.b32.xlu1 %v1191_v12, %s2438_s3 }
 0xcce   :  { %v1192_v14 = vmul.f32 %v2229_v40, %v1188_v13  ;;  %v1125_v17 = vpop.permute.xlu1 %1124 }
 0xccf   :  { %v1130_v4 = vmul.f32 %v2231_v15, %v1125_v17 }
 0xcd0   :  { %1197 = vrot.lane.b32.xlu0 %v1192_v14, %s2438_s3 }
 0xcd1   :  { %1134 = vrot.lane.b32.xlu1 %v1130_v4, %s2438_s3 }
 0xd3e   :  { %v1137_v20 = vpop.permute.xlu0 %1136 }
 0xd3f   :  { %v2758_v22 = vadd.f32 %v1137_v20, %v1121_v19  ;;  %v1196_v29 = vpop.permute.xlu1 %1195 }
 0xd40   :  { %v2764_v34 = vadd.f32 %v1196_v29, %v1181_v26 }
 0xd41   :  { %2232 = vtanh.f32 %v2758_v22 }
 0xd42   :  { %v1198_v35 = vpop.permute.xlu0 %1197  ;;  %2234 = vtanh.f32 %v2764_v34 }
 0xd43   :  { %v2766_v39 = vadd.f32 %v1198_v35, %v1182_v30  ;;  %v1135_v37 = vpop.permute.xlu1 %1134 }
 0xd44   :  { %v2770_v59 = vadd.f32 %v1135_v37, %v1120_v61 }
 0xd45   :  { %2236 = vtanh.f32 %v2766_v39 }
 0xd46   :  { %2238 = vtanh.f32 %v2770_v59 }
 0xd4b   :  { %v2233_v38 = vpop.eup %2232 }
 0xd4c   :  { %1148 = vrot.lane.b32.xlu0 %v2233_v38, %s2438_s3  ;;  %v2235_v3 = vpop.eup %2234 }
 0xd4d   :  { %1207 = vrot.lane.b32.xlu1 %v2235_v3, %s2438_s3 }
 0xd4f   :  { %v2237_v31 = vpop.eup %2236 }
 0xd50   :  { %1209 = vrot.lane.b32.xlu0 %v2237_v31, %s2438_s3  ;;  %v2239_v6 = vpop.eup %2238 }
 0xd51   :  { %1146 = vrot.lane.b32.xlu1 %v2239_v6, %s2438_s3  ;;  %v1331_v6 = vrot.slane %v2758_v22, 7 }
 0xdbe   :  { %v1149_v44 = vpop.permute.xlu0 %1148 }
 0xdbf   :  { %v1208_v10 = vpop.permute.xlu1 %1207  ;;  %v1153_v45 = vmul.f32 %v2225_v25, %v1149_v44 }
 0xdc0   :  { %v1213_v46 = vmul.f32 %v2227_v41, %v1208_v10 }
 0xdc1   :  { %v1217_v54 = vrot.slane %v1153_v45, 7 }
 0xdc2   :  { %v1210_v47 = vpop.permute.xlu0 %1209  ;;  %v1225_v50 = vrot.slane %v1213_v46, 7  ;;  %v1391_v46 = vrot.slane %v2764_v34, 1 }
 0xdc3   :  { %v1214_v48 = vmul.f32 %v2229_v40, %v1210_v47  ;;  %v1147_v53 = vpop.permute.xlu1 %1146  ;;  %v1392_v47 = vrot.slane %v2766_v39, 1 }
 0xdc4   :  { %v1152_v56 = vmul.f32 %v2231_v15, %v1147_v53  ;;  %v1330_v53 = vrot.slane %v2770_v59, 7 }
 0xdc5   :  { %v1226_v51 = vrot.slane %v1214_v48, 6 }
 0xdc6   :  { %v1219_v58 = vsel %vm1218_vm7, %v1217_v54, %v1152_v56 }
 0xdc7   :  { %v1227_v57 = vsel %vm1218_vm7, %v1226_v51, %v1225_v50  ;;  %1220 = vrot.lane.b32.xlu0 %v1219_v58, %s2440_s29 }
 0xdc8   :  { %1228 = vrot.lane.b32.xlu1 %v1227_v57, %s2439_s26 }
 0xe39   :  { %v1221_v62 = vpop.permute.xlu0 %1220 }
 0xe3a   :  { %v1229_v60 = vpop.permute.xlu1 %1228 }
 0xe3b   :  { %v1231_v63 = vsel %vm377_vm2, %v1221_v62, %v1229_v60 }
 0xe3c   :  { %v1233_v1 = vrot.slane %v1231_v63, 4 }
 0xe3e   :  { %1921 = vmatmul.mubr.msk.f32.vlgmr.msra.gmra.mrb[8].mxu0 %vm177_vm3, %v1233_v1 }
 0xe3f   :  { %2055 = vmatpush1.bf16.msra.mxu0 %v2513_v8  ;;  %1727 = vmatprep.mubr.f32.mxu0 %v2437_v0 }
 0xe40   :  { %2057 = vmatprep.subr.bf16.mxu0 %v2515_v9 }
 0xe43   :  { %2059 = vmatpush1.bf16.msra.mxu0 %v2519_v16 }
 0xe44   :  { %2061 = vmatprep.subr.bf16.mxu0 %v2522_v21 }
 0xe47   :  { %2063 = vmatpush1.bf16.msra.mxu0 %v2525_v27 }
 0xe48   :  { %2065 = vmatprep.subr.bf16.mxu0 %v2529_v28 }
 0xe4b   :  { %2067 = vmatpush1.bf16.msra.mxu0 %v2535_v32 }
 0xf11   :  { %v1302_v2 = vpop.f32.mrb[8].mxu0 }
 0xf12   :  { %v1309_v5 = vrot.slane %v1302_v2, 4  ;;  %v1304_v7 = vpop.f32.mrb[9].mxu0  ;;  %v1308_v0 = vrot.slane %v1302_v2, 3 }
 0xf13   :  { %v1369_v8 = vrot.slane %v1304_v7, 6  ;;  %v1370_v42 = vrot.slane %v1304_v7, 7 }
 0xf14   :  { %v1313_v25 = vadd.f32 %v1309_v5, %v2562_v43  ;;  %v1312_v21 = vadd.f32 %v1308_v0, %v2571_v55 }
 0xf15   :  { %v1373_v9 = vadd.f32 %v1369_v8, %v2567_v52  ;;  %v1374_v16 = vadd.f32 %v1370_v42, %v2564_v49 }
 0xf16   :  { %2240 = vtanh.f32 %v1313_v25  ;;  %v1923_v41 = vmul.f32 -1.442695, %v1313_v25  ;;  %v1922_v12 = vmul.f32 -1.442695, %v1312_v21 }
 0xf17   :  { %2242 = vtanh.f32 %v1373_v9  ;;  %v1924_v11 = vmul.f32 -1.442695, %v1373_v9  ;;  %v1925_v40 = vmul.f32 -1.442695, %v1374_v16 }
 0xf18   :  { %2244 = vtanh.f32 %v1374_v16 }
 0xf19   :  { %2246 = vtanh.f32 %v1312_v21 }
 0xf1a   :  { %2248 = vpow2.f32 %v1923_v41 }
 0xf1b   :  { %2250 = vpow2.f32 %v1924_v11 }
 0xf1c   :  { %2252 = vpow2.f32 %v1925_v40 }
 0xf1d   :  { %2254 = vpow2.f32 %v1922_v12 }
 0xf20   :  { %v2241_v27 = vpop.eup %2240 }
 0xf21   :  { %1340 = vrot.lane.b32.xlu0 %v2241_v27, %s2438_s3  ;;  %v2243_v28 = vpop.eup %2242 }
 0xf22   :  { %v2245_v32 = vpop.eup %2244  ;;  %1399 = vrot.lane.b32.xlu1 %v2243_v28, %s2438_s3 }
 0xf23   :  { %v2247_v36 = vpop.eup %2246 }
 0xf24   :  { %v2249_v13 = vpop.eup %2248 }
 0xf25   :  { %1401 = vrot.lane.b32.xlu0 %v2245_v32, %s2438_s3  ;;  %v1321_v14 = vadd.f32 1.0, %v2249_v13  ;;  %v2251_v15 = vpop.eup %2250 }
 0xf26   :  { %1338 = vrot.lane.b32.xlu1 %v2247_v36, %s2438_s3  ;;  %v2253_v17 = vpop.eup %2252  ;;  %v1381_v4 = vadd.f32 1.0, %v2251_v15 }
 0xf27   :  { %2256 = vrcp.f32 %v1321_v14  ;;  %v2255_v18 = vpop.eup %2254  ;;  %v1382_v19 = vadd.f32 1.0, %v2253_v17 }
 0xf28   :  { %v1320_v20 = vadd.f32 1.0, %v2255_v18  ;;  %2258 = vrcp.f32 %v1381_v4 }
 0xf29   :  { %2260 = vrcp.f32 %v1382_v19 }
 0xf2a   :  { %2262 = vrcp.f32 %v1320_v20 }
 0xf31   :  { %v2257_v23 = vpop.eup %2256 }
 0xf32   :  { %v2259_v29 = vpop.eup %2258  ;;  %v1335_v44 = vmul.f32 %v2257_v23, %v1331_v6 }
 0xf33   :  { %v2261_v33 = vpop.eup %2260  ;;  %v1395_v48 = vmul.f32 %v2259_v29, %v1391_v46 }
 0xf34   :  { %v2263_v38 = vpop.eup %2262  ;;  %v1396_v51 = vmul.f32 %v2261_v33, %v1392_v47 }
 0xf35   :  { %v1334_v22 = vmul.f32 %v2263_v38, %v1330_v53 }
 0xf93   :  { %v1341_v24 = vpop.permute.xlu0 %1340 }
 0xf94   :  { %v1345_v26 = vmul.f32 %v2257_v23, %v1341_v24  ;;  %v1400_v30 = vpop.permute.xlu1 %1399 }
 0xf95   :  { %v1405_v35 = vmul.f32 %v2259_v29, %v1400_v30 }
 0xf96   :  { %1350 = vrot.lane.b32.xlu0 %v1345_v26, %s2438_s3 }
 0xf97   :  { %v1402_v61 = vpop.permute.xlu0 %1401  ;;  %1409 = vrot.lane.b32.xlu1 %v1405_v35, %s2438_s3 }
 0xf98   :  { %v1406_v37 = vmul.f32 %v2261_v33, %v1402_v61  ;;  %v1339_v3 = vpop.permute.xlu1 %1338 }
 0xf99   :  { %v1344_v31 = vmul.f32 %v2263_v38, %v1339_v3 }
 0xf9a   :  { %1411 = vrot.lane.b32.xlu0 %v1406_v37, %s2438_s3 }
 0xf9b   :  { %1348 = vrot.lane.b32.xlu1 %v1344_v31, %s2438_s3 }
0x1008   :  { %v1351_v10 = vpop.permute.xlu0 %1350 }
0x1009   :  { %v2802_v45 = vadd.f32 %v1351_v10, %v1335_v44  ;;  %v1410_v50 = vpop.permute.xlu1 %1409 }
0x100a   :  { %v2808_v54 = vadd.f32 %v1410_v50, %v1395_v48 }
0x100b   :  { %2264 = vtanh.f32 %v2802_v45 }
0x100c   :  { %v1412_v56 = vpop.permute.xlu0 %1411  ;;  %2266 = vtanh.f32 %v2808_v54 }
0x100d   :  { %v2810_v57 = vadd.f32 %v1412_v56, %v1396_v51  ;;  %v1349_v34 = vpop.permute.xlu1 %1348 }
0x100e   :  { %v2814_v58 = vadd.f32 %v1349_v34, %v1334_v22 }
0x100f   :  { %2268 = vtanh.f32 %v2810_v57 }
0x1010   :  { %2270 = vtanh.f32 %v2814_v58 }
0x1015   :  { %v2265_v39 = vpop.eup %2264 }
0x1016   :  { %1362 = vrot.lane.b32.xlu0 %v2265_v39, %s2438_s3  ;;  %v2267_v60 = vpop.eup %2266 }
0x1017   :  { %1421 = vrot.lane.b32.xlu1 %v2267_v60, %s2438_s3 }
0x1019   :  { %v2269_v59 = vpop.eup %2268 }
0x101a   :  { %1423 = vrot.lane.b32.xlu0 %v2269_v59, %s2438_s3  ;;  %v2271_v62 = vpop.eup %2270  ;;  %v1545_v59 = vrot.slane %v2802_v45, 7 }
0x101b   :  { %1360 = vrot.lane.b32.xlu1 %v2271_v62, %s2438_s3 }
0x1088   :  { %v1363_v63 = vpop.permute.xlu0 %1362 }
0x1089   :  { %v1422_v1 = vpop.permute.xlu1 %1421  ;;  %v1367_v2 = vmul.f32 %v2257_v23, %v1363_v63 }
0x108a   :  { %v1427_v5 = vmul.f32 %v2259_v29, %v1422_v1  ;;  %v1605_v1 = vrot.slane %v2810_v57, 1 }
0x108b   :  { %v1431_v9 = vrot.slane %v1367_v2, 7 }
0x108c   :  { %v1424_v7 = vpop.permute.xlu0 %1423  ;;  %v1439_v8 = vrot.slane %v1427_v5, 5  ;;  %v1604_v5 = vrot.slane %v2808_v54, 1 }
0x108d   :  { %v1428_v25 = vmul.f32 %v2261_v33, %v1424_v7  ;;  %v1361_v0 = vpop.permute.xlu1 %1360 }
0x108e   :  { %v1366_v16 = vmul.f32 %v2263_v38, %v1361_v0 }
0x108f   :  { %v1440_v42 = vrot.slane %v1428_v25, 4 }
0x1090   :  { %v1433_v27 = vsel %vm1432_vm8, %v1431_v9, %v1366_v16  ;;  %v1544_v9 = vrot.slane %v2814_v58, 7 }
0x1091   :  { %v1441_v21 = vsel %vm1432_vm8, %v1440_v42, %v1439_v8  ;;  %1434 = vrot.lane.b32.xlu0 %v1433_v27, %s2440_s29 }
0x1092   :  { %1442 = vrot.lane.b32.xlu1 %v1441_v21, %s2439_s26 }
0x1103   :  { %v1435_v32 = vpop.permute.xlu0 %1434 }
0x1104   :  { %v1443_v28 = vpop.permute.xlu1 %1442 }
0x1105   :  { %v1445_v36 = vsel %vm377_vm2, %v1435_v32, %v1443_v28 }
0x1106   :  { %v1447_v41 = vrot.slane %v1445_v36, 5 }
0x1108   :  { %1926 = vmatmul.mubr.msk.f32.vlgmr.msra.gmra.mrb[6].mxu1 %vm177_vm3, %v1447_v41 }
0x11db   :  { %v1516_v11 = vpop.f32.mrb[6].mxu1 }
0x11dc   :  { %v1523_v40 = vrot.slane %v1516_v11, 3  ;;  %v1518_v12 = vpop.f32.mrb[7].mxu1  ;;  %v1522_v17 = vrot.slane %v1516_v11, 2 }
0x11dd   :  { %v1583_v14 = vrot.slane %v1518_v12, 7  ;;  %v1587_v15 = vadd.f32 %v1518_v12, %v2564_v49 }
0x11de   :  { %v1527_v13 = vadd.f32 %v1523_v40, %v2562_v43  ;;  %v1526_v18 = vadd.f32 %v1522_v17, %v2571_v55 }
0x11df   :  { %v1586_v4 = vadd.f32 %v1583_v14, %v2567_v52  ;;  %v1930_v29 = vmul.f32 -1.442695, %v1587_v15 }
0x11e0   :  { %2272 = vtanh.f32 %v1527_v13  ;;  %v1928_v26 = vmul.f32 -1.442695, %v1527_v13  ;;  %v1927_v33 = vmul.f32 -1.442695, %v1526_v18 }
0x11e1   :  { %2274 = vtanh.f32 %v1587_v15  ;;  %v1929_v30 = vmul.f32 -1.442695, %v1586_v4 }
0x11e2   :  { %2276 = vtanh.f32 %v1586_v4 }
0x11e3   :  { %2278 = vtanh.f32 %v1526_v18 }
0x11e4   :  { %2280 = vpow2.f32 %v1928_v26 }
0x11e5   :  { %2282 = vpow2.f32 %v1930_v29 }
0x11e6   :  { %2284 = vpow2.f32 %v1929_v30 }
0x11e7   :  { %2286 = vpow2.f32 %v1927_v33 }
0x11ea   :  { %v2273_v19 = vpop.eup %2272 }
0x11eb   :  { %1554 = vrot.lane.b32.xlu0 %v2273_v19, %s2438_s3  ;;  %v2275_v20 = vpop.eup %2274 }
0x11ec   :  { %v2277_v23 = vpop.eup %2276 }
0x11ed   :  { %1612 = vrot.lane.b32.xlu1 %v2277_v23, %s2438_s3  ;;  %v2279_v24 = vpop.eup %2278 }
0x11ee   :  { %v2281_v35 = vpop.eup %2280 }
0x11ef   :  { %1614 = vrot.lane.b32.xlu0 %v2275_v20, %s2438_s3  ;;  %v1535_v61 = vadd.f32 1.0, %v2281_v35  ;;  %v2283_v37 = vpop.eup %2282 }
0x11f0   :  { %v2285_v38 = vpop.eup %2284  ;;  %v1595_v3 = vadd.f32 1.0, %v2283_v37 }
0x11f1   :  { %1552 = vrot.lane.b32.xlu1 %v2279_v24, %s2438_s3  ;;  %2288 = vrcp.f32 %v1535_v61  ;;  %v1594_v31 = vadd.f32 1.0, %v2285_v38  ;;  %v2287_v6 = vpop.eup %2286 }
0x11f2   :  { %2290 = vrcp.f32 %v1595_v3  ;;  %v1534_v44 = vadd.f32 1.0, %v2287_v6 }
0x11f3   :  { %2292 = vrcp.f32 %v1594_v31 }
0x11f4   :  { %2294 = vrcp.f32 %v1534_v44 }
0x11fb   :  { %v2289_v10 = vpop.eup %2288 }
0x11fc   :  { %v2291_v48 = vpop.eup %2290  ;;  %v1549_v62 = vmul.f32 %v2289_v10, %v1545_v59 }
0x11fd   :  { %v2293_v51 = vpop.eup %2292  ;;  %v1609_v7 = vmul.f32 %v2291_v48, %v1605_v1 }
0x11fe   :  { %v2295_v34 = vpop.eup %2294  ;;  %v1608_v25 = vmul.f32 %v2293_v51, %v1604_v5 }
0x11ff   :  { %v1548_v45 = vmul.f32 %v2295_v34, %v1544_v9 }
0x125d   :  { %v1555_v46 = vpop.permute.xlu0 %1554 }
0x125e   :  { %v1559_v47 = vmul.f32 %v2289_v10, %v1555_v46 }
0x125f   :  { %v1613_v53 = vpop.permute.xlu1 %1612 }
0x1260   :  { %1564 = vrot.lane.b32.xlu0 %v1559_v47, %s2438_s3  ;;  %v1618_v22 = vmul.f32 %v2293_v51, %v1613_v53 }
0x1261   :  { %v1615_v50 = vpop.permute.xlu0 %1614 }
0x1262   :  { %v1619_v56 = vmul.f32 %v2291_v48, %v1615_v50  ;;  %1622 = vrot.lane.b32.xlu1 %v1618_v22, %s2438_s3 }
0x1263   :  { %v1553_v39 = vpop.permute.xlu1 %1552 }
0x1264   :  { %1624 = vrot.lane.b32.xlu0 %v1619_v56, %s2438_s3  ;;  %v1558_v60 = vmul.f32 %v2295_v34, %v1553_v39 }
0x1266   :  { %1562 = vrot.lane.b32.xlu1 %v1558_v60, %s2438_s3 }
0x12d2   :  { %v1565_v63 = vpop.permute.xlu0 %1564 }
0x12d3   :  { %v2839_v2 = vadd.f32 %v1565_v63, %v1549_v62 }
0x12d4   :  { %v1623_v42 = vpop.permute.xlu1 %1622 }
0x12d5   :  { %2296 = vtanh.f32 %v2839_v2  ;;  %v2846_v16 = vadd.f32 %v1623_v42, %v1608_v25 }
0x12d6   :  { %v1625_v8 = vpop.permute.xlu0 %1624 }
0x12d7   :  { %v2843_v0 = vadd.f32 %v1625_v8, %v1609_v7 }
0x12d8   :  { %v1563_v57 = vpop.permute.xlu1 %1562 }
0x12d9   :  { %2298 = vtanh.f32 %v2843_v0  ;;  %v2850_v21 = vadd.f32 %v1563_v57, %v1548_v45  ;;  %v1817_v45 = vrot.slane %v2846_v16, 1  ;;  %v1758_v57 = vrot.slane %v2839_v2, 7 }
0x12da   :  { %2300 = vtanh.f32 %v2846_v16 }
0x12db   :  { %2302 = vtanh.f32 %v2850_v21 }
0x12df   :  { %v2297_v54 = vpop.eup %2296 }
0x12e0   :  { %1576 = vrot.lane.b32.xlu0 %v2297_v54, %s2438_s3 }
0x12e3   :  { %v2299_v27 = vpop.eup %2298 }
0x12e4   :  { %v2301_v28 = vpop.eup %2300  ;;  %1636 = vrot.lane.b32.xlu0 %v2299_v27, %s2438_s3 }
0x12e5   :  { %1634 = vrot.lane.b32.xlu1 %v2301_v28, %s2438_s3  ;;  %v2303_v58 = vpop.eup %2302 }
0x12e9   :  { %1574 = vrot.lane.b32.xlu1 %v2303_v58, %s2438_s3 }
0x1352   :  { %v1577_v32 = vpop.permute.xlu0 %1576 }
0x1353   :  { %v1581_v40 = vmul.f32 %v2289_v10, %v1577_v32 }
0x1355   :  { %v1644_v17 = vrot.slane %v1581_v40, 7 }
0x1356   :  { %v1637_v36 = vpop.permute.xlu0 %1636 }
0x1357   :  { %v1635_v41 = vpop.permute.xlu1 %1634  ;;  %v1641_v11 = vmul.f32 %v2291_v48, %v1637_v36  ;;  %v1757_v36 = vrot.slane %v2850_v21, 7 }
0x1358   :  { %v1640_v12 = vmul.f32 %v2293_v51, %v1635_v41 }
0x1359   :  { %v1653_v13 = vrot.slane %v1641_v11, 2  ;;  %v1818_v11 = vrot.slane %v2843_v0, 1 }
0x135a   :  { %v1652_v14 = vrot.slane %v1640_v12, 3 }
0x135b   :  { %v1575_v15 = vpop.permute.xlu1 %1574 }
0x135c   :  { %v1580_v4 = vmul.f32 %v2295_v34, %v1575_v15  ;;  %v1654_v18 = vsel %vm1645_vm9, %v1653_v13, %v1652_v14 }
0x135d   :  { %1655 = vrot.lane.b32.xlu1 %v1654_v18, %s2439_s26 }
0x135e   :  { %v1646_v19 = vsel %vm1645_vm9, %v1644_v17, %v1580_v4 }
0x135f   :  { %1647 = vrot.lane.b32.xlu0 %v1646_v19, %s2440_s29 }
0x13cf   :  { %v1656_v20 = vpop.permute.xlu1 %1655 }
0x13d1   :  { %v1648_v23 = vpop.permute.xlu0 %1647 }
0x13d2   :  { %v1658_v24 = vsel %vm377_vm2, %v1648_v23, %v1656_v20 }
0x13d3   :  { %v1660_v26 = vrot.slane %v1658_v24, 6 }
0x13d5   :  { %1931 = vmatmul.mubr.msk.f32.vlgmr.msra.gmra.mrb[10].mxu0 %vm177_vm3, %v1660_v26 }
0x14a8   :  { %v1729_v29 = vpop.f32.mrb[10].mxu0 }
0x14a9   :  { %v1736_v30 = vrot.slane %v1729_v29, 2  ;;  %v1731_v33 = vpop.f32.mrb[11].mxu0  ;;  %v1735_v35 = vrot.slane %v1729_v29, 1 }
0x14aa   :  { %v1799_v61 = vadd.f32 %v1731_v33, %v2567_v52  ;;  %v1796_v38 = vrot.slane %v1731_v33, 1 }
0x14ab   :  { %v1740_v37 = vadd.f32 %v1736_v30, %v2562_v43  ;;  %v1739_v3 = vadd.f32 %v1735_v35, %v2571_v55 }
0x14ac   :  { %2304 = vtanh.f32 %v1799_v61  ;;  %v1800_v31 = vadd.f32 %v1796_v38, %v2564_v49  ;;  %v1934_v43 = vmul.f32 -1.442695, %v1799_v61 }
0x14ad   :  { %2306 = vtanh.f32 %v1740_v37  ;;  %v1933_v52 = vmul.f32 -1.442695, %v1740_v37  ;;  %v1932_v55 = vmul.f32 -1.442695, %v1739_v3 }
0x14ae   :  { %2308 = vtanh.f32 %v1739_v3  ;;  %v1935_v49 = vmul.f32 -1.442695, %v1800_v31 }
0x14af   :  { %2310 = vtanh.f32 %v1800_v31 }
0x14b0   :  { %2312 = vpow2.f32 %v1934_v43 }
0x14b1   :  { %2314 = vpow2.f32 %v1933_v52 }
0x14b2   :  { %2316 = vpow2.f32 %v1932_v55 }
0x14b3   :  { %2318 = vpow2.f32 %v1935_v49 }
0x14b6   :  { %v2305_v6 = vpop.eup %2304 }
0x14b7   :  { %1825 = vrot.lane.b32.xlu1 %v2305_v6, %s2438_s3  ;;  %v2307_v44 = vpop.eup %2306 }
0x14b8   :  { %1767 = vrot.lane.b32.xlu0 %v2307_v44, %s2438_s3  ;;  %v2309_v10 = vpop.eup %2308 }
0x14b9   :  { %v2311_v46 = vpop.eup %2310 }
0x14ba   :  { %v2313_v47 = vpop.eup %2312 }
0x14bb   :  { %1827 = vrot.lane.b32.xlu1 %v2311_v46, %s2438_s3  ;;  %v2315_v48 = vpop.eup %2314  ;;  %v1807_v50 = vadd.f32 1.0, %v2313_v47 }
0x14bc   :  { %1765 = vrot.lane.b32.xlu0 %v2309_v10, %s2438_s3  ;;  %v1748_v51 = vadd.f32 1.0, %v2315_v48  ;;  %v2317_v53 = vpop.eup %2316 }
0x14bd   :  { %v2319_v56 = vpop.eup %2318  ;;  %2320 = vrcp.f32 %v1807_v50  ;;  %v1747_v22 = vadd.f32 1.0, %v2317_v53 }
0x14be   :  { %2322 = vrcp.f32 %v1748_v51  ;;  %v1808_v34 = vadd.f32 1.0, %v2319_v56 }
0x14bf   :  { %2324 = vrcp.f32 %v1747_v22 }
0x14c0   :  { %2326 = vrcp.f32 %v1808_v34 }
0x14c7   :  { %v2321_v39 = vpop.eup %2320 }
0x14c8   :  { %v2323_v62 = vpop.eup %2322  ;;  %v1821_v54 = vmul.f32 %v2321_v39, %v1817_v45 }
0x14c9   :  { %v2325_v5 = vpop.eup %2324  ;;  %v1762_v58 = vmul.f32 %v2323_v62, %v1758_v57 }
0x14ca   :  { %v2327_v25 = vpop.eup %2326  ;;  %v1761_v40 = vmul.f32 %v2325_v5, %v1757_v36 }
0x14cb   :  { %v1822_v12 = vmul.f32 %v2327_v25, %v1818_v11 }
0x1529   :  { %v1826_v60 = vpop.permute.xlu1 %1825 }
0x152a   :  { %v1831_v59 = vmul.f32 %v2321_v39, %v1826_v60  ;;  %v1768_v63 = vpop.permute.xlu0 %1767 }
0x152b   :  { %v1772_v1 = vmul.f32 %v2323_v62, %v1768_v63 }
0x152c   :  { %1835 = vrot.lane.b32.xlu1 %v1831_v59, %s2438_s3 }
0x152d   :  { %1777 = vrot.lane.b32.xlu0 %v1772_v1, %s2438_s3  ;;  %v1828_v8 = vpop.permute.xlu1 %1827 }
0x152e   :  { %v1766_v7 = vpop.permute.xlu0 %1765  ;;  %v1832_v9 = vmul.f32 %v2327_v25, %v1828_v8 }
0x152f   :  { %v1771_v42 = vmul.f32 %v2325_v5, %v1766_v7 }
0x1530   :  { %1837 = vrot.lane.b32.xlu1 %v1832_v9, %s2438_s3 }
0x1531   :  { %1775 = vrot.lane.b32.xlu0 %v1771_v42, %s2438_s3 }
0x159e   :  { %v1836_v27 = vpop.permute.xlu1 %1835 }
0x159f   :  { %v1841_v28 = vadd.f32 %v1836_v27, %v1821_v54  ;;  %v1778_v32 = vpop.permute.xlu0 %1777 }
0x15a0   :  { %v1782_v41 = vadd.f32 %v1778_v32, %v1762_v58 }
0x15a1   :  { %2328 = vtanh.f32 %v1841_v28 }
0x15a2   :  { %2330 = vtanh.f32 %v1782_v41  ;;  %v1838_v14 = vpop.permute.xlu1 %1837 }
0x15a3   :  { %v1776_v13 = vpop.permute.xlu0 %1775  ;;  %v1842_v16 = vadd.f32 %v1838_v14, %v1822_v12 }
0x15a4   :  { %v1781_v15 = vadd.f32 %v1776_v13, %v1761_v40 }
0x15a6   :  { %2332 = vtanh.f32 %v1781_v15 }
0x15a7   :  { %2334 = vtanh.f32 %v1842_v16 }
0x15ab   :  { %v2329_v2 = vpop.eup %2328 }
0x15ac   :  { %1847 = vrot.lane.b32.xlu1 %v2329_v2, %s2438_s3  ;;  %v2331_v17 = vpop.eup %2330 }
0x15ad   :  { %1789 = vrot.lane.b32.xlu0 %v2331_v17, %s2438_s3 }
0x15b0   :  { %v2333_v21 = vpop.eup %2332 }
0x15b1   :  { %v2335_v4 = vpop.eup %2334  ;;  %1787 = vrot.lane.b32.xlu0 %v2333_v21, %s2438_s3 }
0x15b2   :  { %1849 = vrot.lane.b32.xlu1 %v2335_v4, %s2438_s3 }
0x161e   :  { %v1848_v0 = vpop.permute.xlu1 %1847 }
0x161f   :  { %v1790_v18 = vpop.permute.xlu0 %1789  ;;  %v1853_v24 = vmul.f32 %v2321_v39, %v1848_v0 }
0x1620   :  { %v1794_v19 = vmul.f32 %v2323_v62, %v1790_v18 }
0x1621   :  { %v1866_v33 = vrot.slane %v1853_v24, 1 }
0x1622   :  { %v1857_v20 = vrot.slane %v1794_v19, 7 }
0x1623   :  { %v1788_v23 = vpop.permute.xlu0 %1787 }
0x1624   :  { %v1850_v26 = vpop.permute.xlu1 %1849  ;;  %v1793_v29 = vmul.f32 %v2325_v5, %v1788_v23  ;;  %1860 = vrot.lane.b32.xlu1 %v1857_v20, %s2440_s29 }
0x1625   :  { %v1854_v30 = vmul.f32 %v2327_v25, %v1850_v26 }
0x1626   :  { %1858 = vrot.lane.b32.xlu0 %v1793_v29, %s2440_s29 }
0x1628   :  { %1869 = vrot.lane.b32.xlu1 %v1854_v30, %s2439_s26 }
0x162a   :  { %1867 = vrot.lane.b32.xlu0 %v1866_v33, %s2439_s26 }
0x1696   :  { %v1861_v35 = vpop.permute.xlu1 %1860 }
0x1698   :  { %v1859_v61 = vpop.permute.xlu0 %1858 }
0x169a   :  { %v1870_v37 = vpop.permute.xlu1 %1869 }
0x169b   :  { %v1874_v38 = vsel %vm377_vm2, %v1861_v35, %v1870_v37 }
0x169c   :  { %v1868_v3 = vpop.permute.xlu0 %1867  ;;  %1878 = vst.msk [vmem:[#allocation8 + $0x1] sm:$0x1] %vm1877_vm10, %v1874_v38 }
0x169d   :  { %v1873_v31 = vsel %vm377_vm2, %v1859_v61, %v1868_v3 }
0x169e   :  { %1876 = vst.msk [vmem:[#allocation8 - $0x7] sm:$0x80] %vm1875_vm11, %v1873_v31 }
0x169f   :  { %2413 = shalt.err (!%p2410_p0)
}
0x16a0   :  { %s2414_s9 = scalar_lea.hbm %s2903_s4, 32 }
0x16a1   :  { %p2415_p1 = scmp.ne.s32.totalorder %s2903_s4, %s2414_s9  ;;  %p2418_p2 = scmp.lt.u32.totalorder %s2414_s9, %s2903_s4 }
0x16a3   :  { %p2420_p3 = pnand %p2418_p2, %p2415_p1 }
0x16a5   :  { %2423 = shalt.err (!%p2420_p3)
}
0x16a6   :  { %1888 = dma.vmem_to_hbm [thread:$0]  %s1886_s5, 32, %s2903_s4, [#allocation4]  }
0x16a7   :  { %2428 = dma.done.wait [#allocation4], 32  }
0x16a8   :  { %2429 = vsyncadd [#allocation4], 4294967264 }
0x16a9   :  { %1892 = vsyncpa [#allocation3], 1 }
0x16aa   :  { %1893 = vsyncpa [#allocation6], 1 }
0x16ab   :  { %1894 = vsyncpa [#allocation4], 1 }

</bundles_post_ra>
